<compile_context>
chip_gen: v5e
topology: v5e:2x2
jax: 0.10.0
libtpu: 0.0.40
codegen_flags: <defaults>
</compile_context>

<pallas_src>
import functools

import jax
import jax.numpy as jnp
from jax.experimental import pallas as pl
from jax.experimental.pallas import tpu as pltpu

N_FIELDS = 8  # x, y, heading, vx, vy, width, length, class

_VMEM_LIMIT_BYTES = 32 * 1024 * 1024   # safe on every generation (v5e scoped default is
                                       # 16 MiB; v7x physical per-TC is 64 MiB)
_TEMP_VMEM_BUDGET = 12 * 1024 * 1024   # budget for the (Bt, N, N) temporaries; leaves
                                       # headroom for double-buffered I/O + compiler scratch
_MAX_BLOCK_BATCHES = 64                # bounds the vreg-spill region and the row-pack loop


def _num_tensorcores():
    """TensorCores per device: 2 on megacore / v7x parts, 1 on v5e / v6e."""
    try:
        kind = str(jax.devices()[0].device_kind).lower()
    except Exception:
        return 1
    return 2 if any(t in kind for t in ("v4", "v5p", "v7", "7x")) else 1


def _block_batches(n):
    """Max batch rows per block so the live (Bt, N, N) temporaries fit the VMEM budget."""
    # ~3 live f32 NxN temporaries (diffs / d2 / compare) + 1 bf16 mask + per-row I/O.
    per_batch = n * n * (3 * 4 + 2) + n * (N_FIELDS * (2 + 4) + 16)
    bt = _TEMP_VMEM_BUDGET // max(per_batch, 1)
    return int(max(8, min(_MAX_BLOCK_BATCHES, (bt // 8) * 8)))


def _gump_render_kernel(scale, offset, eps, tok_ref, xy_ref, valid_ref,
                        det_t_ref, keep_ref):
    """One block of Bt batch elements: detokenize + eps-filter.

    tok_ref:    (Bt, F, N) int16  quantized tokens, lane-dense (N on lanes)
    xy_ref:     (Bt, N, 2) int32  agent-major x/y tokens (pairwise "column" operand)
    valid_ref:  (Bt, 1, N) int32  1 = slot holds an agent
    det_t_ref:  (Bt, F, N) f32    detokenized agent states (transposed, lane-dense),
                                  zeroed where the agent is dropped
    keep_ref:   (Bt, N)    int32  1 = agent survives filter_data(eps)
    """
    bt, nf, n = tok_ref.shape

    # ---- detokenize_data: uniform bin de-quantization (elementwise, VPU) ----
    # Dequant tables as (1, F, 1) constants built from scalar splats over a sublane iota
    # (no dense vector constants, no per-step DMA of a table).
    fidx = jax.lax.broadcasted_iota(jnp.int32, (1, nf, 1), 1)
    scale_v = jnp.zeros((1, nf, 1), jnp.float32)
    offset_v = jnp.zeros((1, nf, 1), jnp.float32)
    for f in range(nf):
        scale_v = jnp.where(fidx == f, jnp.float32(scale[f]), scale_v)
        offset_v = jnp.where(fidx == f, jnp.float32(offset[f]), offset_v)

    det_t = tok_ref[...].astype(jnp.float32) * scale_v + offset_v       # (Bt, F, N)
    # TODO(synk): the class field (index 7) is dequantized/zeroed like the rest; if the
    # real gutils keeps integer class ids for dropped slots this needs separate handling.

    valid_row = valid_ref[...] > 0                                       # (Bt, 1, N) bool

    # ---- filter_data(eps): drop agents within eps of an earlier valid agent ----
    # Rows (j index, lanes) come straight from the lane-dense det_t; columns (i index,
    # sublanes) come from the tiny agent-major x/y side input -> no in-kernel transpose.
    x_row = det_t[:, 0:1, :]                                             # (Bt, 1, N)
    y_row = det_t[:, 1:2, :]
    xy_f = xy_ref[...].astype(jnp.float32)                               # (Bt, N, 2)
    x_col = xy_f[:, :, 0:1] * jnp.float32(scale[0]) + jnp.float32(offset[0])   # (Bt, N, 1)
    y_col = xy_f[:, :, 1:2] * jnp.float32(scale[1]) + jnp.float32(offset[1])

    d2 = jnp.square(x_col - x_row) + jnp.square(y_col - y_row)           # (Bt, N, N) f32

    # Lower-triangular (j < i) mask from (1, N, N) iotas, broadcast only at the final '&'.
    row_i = jax.lax.broadcasted_iota(jnp.int32, (1, n, n), 1)
    col_j = jax.lax.broadcasted_iota(jnp.int32, (1, n, n), 2)
    lower = col_j < row_i                                                # (1, N, N)

    # bf16 0/1 operands: exact (values and partial sums <= N <= 256) and native MXU dtype.
    mask_bf = ((d2 < eps * eps) & lower).astype(jnp.bfloat16)            # (Bt, N, N)
    valid_bf = valid_row.astype(jnp.bfloat16)                            # (Bt, 1, N)

    # conflict_i = sum_j mask[i, j] * valid[j] > 0   (MXU mat-vec, q = 1)
    conflict = jnp.einsum("bqj,bij->bqi", valid_bf, mask_bf,
                          preferred_element_type=jnp.float32) > 0.0      # (Bt, 1, N)
    # TODO(synk): one-shot filter — drops vs. earlier *valid* agents; a strictly sequential
    # filter (vs. earlier *kept* agents) can differ on chains of near-duplicates.

    keep = valid_row & jnp.logical_not(conflict)                         # (Bt, 1, N)

    # Lane-dense output store; keep broadcasts across the F sublanes.
    det_t_ref[...] = jnp.where(keep, det_t, 0.0).astype(det_t_ref.dtype)

    # Pack the keep mask into the dense 2-D (Bt, N) output tile (Bt on sublanes, N on
    # lanes).  Static per-row stores avoid any in-kernel relayout/reshape; Bt <= 64.
    keep_i = keep.astype(jnp.int32)                                      # (Bt, 1, N)
    for b in range(bt):
        keep_ref[pl.ds(b, 1), :] = keep_i[b]


def gump_render(tokens, valid, scale, offset, eps=2.0):
    """JAX wrapper reproducing GUMPRender.forward.

    tokens: (B, N, F) int32 quantized agent tokens
    valid:  (B, N)    int32 occupancy mask
    scale/offset: length-F sequences of Python floats (compile-time dequant tables)
    Returns {"agents": (B, N, F) f32, "valid_mask": (B, N) int32}.
    """
    B, N, F = tokens.shape
    assert valid.shape == (B, N)
    scale = tuple(float(s) for s in scale)
    offset = tuple(float(o) for o in offset)
    assert len(scale) == F and len(offset) == F

    n_cores = _num_tensorcores()
    bt_cap = _block_batches(N)

    # Grid sizing: one grid step per TensorCore (when there is enough batch to keep each
    # per-core block sublane-aligned); extra steps only when the VMEM budget forces them.
    # On single-TC chips (v5e/v6e) extra steps are pure ~0.35 us/step overhead, so G = 1.
    G = n_cores if (n_cores > 1 and B >= 8 * n_cores) else 1
    G = max(G, pl.cdiv(B, bt_cap))
    if n_cores > 1 and G > 1 and G % n_cores:
        G += n_cores - (G % n_cores)        # keep both TCs fed under "parallel"
    Bt = pl.cdiv(B, G)
    if G > 1:
        Bt = pl.cdiv(Bt, 8) * 8             # (Bt, N) output blocks need sublane alignment
    Bp = G * Bt

    tokens_p, valid_p = tokens, valid
    if Bp != B:                              # pad with empty (invalid) batch slots
        tokens_p = jnp.pad(tokens, ((0, Bp - B), (0, 0), (0, 0)))
        valid_p = jnp.pad(valid, ((0, Bp - B), (0, 0)))

    # Layout plumbing (outside the kernel; fuses into the input copies):
    #  * tokens transposed to (B, F, N) -> lane-dense kernel loads, no in-kernel transpose;
    #    int16 halves token DMA bytes (bin ids are small).
    #    TODO(synk): widen back to int32 if a token vocabulary ever exceeds 32767.
    #  * tiny agent-major (B, N, 2) x/y slab provides the pairwise "column" operand.
    tokens_t = jnp.transpose(tokens_p, (0, 2, 1)).astype(jnp.int16)      # (Bp, F, N)
    xy_tok = tokens_p[:, :, 0:2].astype(jnp.int32)                       # (Bp, N, 2)
    valid3 = valid_p.reshape(Bp, 1, N).astype(jnp.int32)                 # (Bp, 1, N)

    kernel = functools.partial(_gump_render_kernel, scale, offset, float(eps))

    det_t, keep = pl.pallas_call(
        kernel,
        out_shape=(
            jax.ShapeDtypeStruct((Bp, F, N), jnp.float32),
            jax.ShapeDtypeStruct((Bp, N), jnp.int32),
        ),
        grid_spec=pltpu.PrefetchScalarGridSpec(
            num_scalar_prefetch=0,
            grid=(G,),
            in_specs=[
                pl.BlockSpec((Bt, F, N), lambda b: (b, 0, 0)),   # tokens, lane-dense
                pl.BlockSpec((Bt, N, 2), lambda b: (b, 0, 0)),   # x/y column operand
                pl.BlockSpec((Bt, 1, N), lambda b: (b, 0, 0)),   # valid mask
            ],
            out_specs=[
                pl.BlockSpec((Bt, F, N), lambda b: (b, 0, 0)),   # agents, transposed
                pl.BlockSpec((Bt, N), lambda b: (b, 0)),         # keep mask, dense 2-D
            ],
        ),
        compiler_params=pltpu.CompilerParams(
            dimension_semantics=("parallel",),
            vmem_limit_bytes=_VMEM_LIMIT_BYTES,
        ),
    )(tokens_t, xy_tok, valid3)

    # Layout plumbing back to the module-facing (B, N, F) / (B, N) shapes.
    agents = jnp.transpose(det_t[:B], (0, 2, 1))
    valid_mask = keep[:B]
    return {"agents": agents, "valid_mask": valid_mask}


def _reference(tokens, valid, scale, offset, eps):
    """Pure-JAX reference of the same forward semantics."""
    scale = jnp.asarray(scale, jnp.float32)[None, None, :]
    offset = jnp.asarray(offset, jnp.float32)[None, None, :]
    det = tokens.astype(jnp.float32) * scale + offset                    # (B, N, F)
    x = det[..., 0]
    y = det[..., 1]
    dx = x[:, :, None] - x[:, None, :]
    dy = y[:, :, None] - y[:, None, :]
    d2 = dx * dx + dy * dy
    n = tokens.shape[1]
    earlier = jnp.arange(n)[None, :] < jnp.arange(n)[:, None]            # j < i
    conflict = jnp.any(earlier[None] & (d2 < eps * eps) & (valid[:, None, :] > 0), axis=-1)
    keep = (valid > 0) & jnp.logical_not(conflict)
    agents = jnp.where(keep[..., None], det, 0.0)
    return agents, keep.astype(jnp.int32)


if __name__ == "__main__":
    key = jax.random.PRNGKey(0)
    B, N, F = 4, 64, N_FIELDS

    k_tok, k_valid = jax.random.split(key)
    # Quantized tokens in a 1024-bin vocabulary per field.
    tokens = jax.random.randint(k_tok, (B, N, F), 0, 1024, dtype=jnp.int32)
    # Roughly 3/4 of the agent slots are occupied.
    valid = (jax.random.uniform(k_valid, (B, N)) < 0.75).astype(jnp.int32)

    # Deterministic detokenization tables (bin width / origin per field):
    # x, y in [-100, 100] m; heading in [-pi, pi]; vx, vy in [-20, 20] m/s;
    # width/length in [0, 10] m; class id passthrough-ish.
    pi = 3.141592653589793
    scale = [200.0 / 1024, 200.0 / 1024, 2 * pi / 1024,
             40.0 / 1024, 40.0 / 1024, 10.0 / 1024, 10.0 / 1024, 1.0]
    offset = [-100.0, -100.0, -pi, -20.0, -20.0, 0.0, 0.0, 0.0]

    out = gump_render(tokens, valid, scale, offset, eps=2.0)
    jax.block_until_ready(out)

    assert out["agents"].shape == (B, N, F)
    assert out["valid_mask"].shape == (B, N)

    ref_agents, ref_keep = _reference(tokens, valid, scale, offset, 2.0)
    assert bool(jnp.all(out["valid_mask"] == ref_keep))
    assert bool(jnp.allclose(out["agents"], ref_agents, rtol=1e-5, atol=1e-3))

    print("KERNEL_OK")
</pallas_src>

<mosaic_0001>
module attributes {stable_mosaic.version = 11 : i64} {
  func.func @_gump_render_kernel(%arg0: i32, %arg1: memref<4x8x64xi16, #tpu.memory_space<vmem>>, %arg2: memref<4x64x2xi32, #tpu.memory_space<vmem>>, %arg3: memref<4x1x64xi32, #tpu.memory_space<vmem>>, %arg4: memref<4x8x64xf32, #tpu.memory_space<vmem>>, %arg5: memref<4x64xi32, #tpu.memory_space<vmem>>) attributes {dimension_semantics = [#tpu.dimension_semantics<parallel>], iteration_bounds = array<i64: 1>, scalar_prefetch = 0 : i64, scratch_operands = 0 : i64, tpu.core_type = #tpu.core_type<tc>, window_params = [{transform_indices = @transform_0, window_bounds = array<i64: 4, 8, 64>}, {transform_indices = @transform_1, window_bounds = array<i64: 4, 64, 2>}, {transform_indices = @transform_2, window_bounds = array<i64: 4, 1, 64>}, {transform_indices = @transform_3, window_bounds = array<i64: 4, 8, 64>}, {transform_indices = @transform_4, window_bounds = array<i64: 4, 64>}]} {
    %0 = tpu.iota {dimensions = array<i32: 1>} : vector<1x8x1xi32>
    %cst = arith.constant 0.000000e+00 : f32
    %1 = vector.broadcast %cst : f32 to vector<1x8x1xf32>
    %cst_0 = arith.constant 0.000000e+00 : f32
    %2 = vector.broadcast %cst_0 : f32 to vector<1x8x1xf32>
    %c0_i32 = arith.constant 0 : i32
    %3 = vector.broadcast %c0_i32 : i32 to vector<1x8x1xi32>
    %4 = arith.cmpi eq, %0, %3 : vector<1x8x1xi32>
    %cst_1 = arith.constant 0.1953125 : f32
    %5 = vector.broadcast %cst_1 : f32 to vector<1x8x1xf32>
    %6 = arith.select %4, %5, %1 : vector<1x8x1xi1>, vector<1x8x1xf32>
    %c0_i32_2 = arith.constant 0 : i32
    %7 = vector.broadcast %c0_i32_2 : i32 to vector<1x8x1xi32>
    %8 = arith.cmpi eq, %0, %7 : vector<1x8x1xi32>
    %cst_3 = arith.constant -1.000000e+02 : f32
    %9 = vector.broadcast %cst_3 : f32 to vector<1x8x1xf32>
    %10 = arith.select %8, %9, %2 : vector<1x8x1xi1>, vector<1x8x1xf32>
    %c1_i32 = arith.constant 1 : i32
    %11 = vector.broadcast %c1_i32 : i32 to vector<1x8x1xi32>
    %12 = arith.cmpi eq, %0, %11 : vector<1x8x1xi32>
    %cst_4 = arith.constant 0.1953125 : f32
    %13 = vector.broadcast %cst_4 : f32 to vector<1x8x1xf32>
    %14 = arith.select %12, %13, %6 : vector<1x8x1xi1>, vector<1x8x1xf32>
    %c1_i32_5 = arith.constant 1 : i32
    %15 = vector.broadcast %c1_i32_5 : i32 to vector<1x8x1xi32>
    %16 = arith.cmpi eq, %0, %15 : vector<1x8x1xi32>
    %cst_6 = arith.constant -1.000000e+02 : f32
    %17 = vector.broadcast %cst_6 : f32 to vector<1x8x1xf32>
    %18 = arith.select %16, %17, %10 : vector<1x8x1xi1>, vector<1x8x1xf32>
    %c2_i32 = arith.constant 2 : i32
    %19 = vector.broadcast %c2_i32 : i32 to vector<1x8x1xi32>
    %20 = arith.cmpi eq, %0, %19 : vector<1x8x1xi32>
    %cst_7 = arith.constant 0.00613592332 : f32
    %21 = vector.broadcast %cst_7 : f32 to vector<1x8x1xf32>
    %22 = arith.select %20, %21, %14 : vector<1x8x1xi1>, vector<1x8x1xf32>
    %c2_i32_8 = arith.constant 2 : i32
    %23 = vector.broadcast %c2_i32_8 : i32 to vector<1x8x1xi32>
    %24 = arith.cmpi eq, %0, %23 : vector<1x8x1xi32>
    %cst_9 = arith.constant -3.14159274 : f32
    %25 = vector.broadcast %cst_9 : f32 to vector<1x8x1xf32>
    %26 = arith.select %24, %25, %18 : vector<1x8x1xi1>, vector<1x8x1xf32>
    %c3_i32 = arith.constant 3 : i32
    %27 = vector.broadcast %c3_i32 : i32 to vector<1x8x1xi32>
    %28 = arith.cmpi eq, %0, %27 : vector<1x8x1xi32>
    %cst_10 = arith.constant 3.906250e-02 : f32
    %29 = vector.broadcast %cst_10 : f32 to vector<1x8x1xf32>
    %30 = arith.select %28, %29, %22 : vector<1x8x1xi1>, vector<1x8x1xf32>
    %c3_i32_11 = arith.constant 3 : i32
    %31 = vector.broadcast %c3_i32_11 : i32 to vector<1x8x1xi32>
    %32 = arith.cmpi eq, %0, %31 : vector<1x8x1xi32>
    %cst_12 = arith.constant -2.000000e+01 : f32
    %33 = vector.broadcast %cst_12 : f32 to vector<1x8x1xf32>
    %34 = arith.select %32, %33, %26 : vector<1x8x1xi1>, vector<1x8x1xf32>
    %c4_i32 = arith.constant 4 : i32
    %35 = vector.broadcast %c4_i32 : i32 to vector<1x8x1xi32>
    %36 = arith.cmpi eq, %0, %35 : vector<1x8x1xi32>
    %cst_13 = arith.constant 3.906250e-02 : f32
    %37 = vector.broadcast %cst_13 : f32 to vector<1x8x1xf32>
    %38 = arith.select %36, %37, %30 : vector<1x8x1xi1>, vector<1x8x1xf32>
    %c4_i32_14 = arith.constant 4 : i32
    %39 = vector.broadcast %c4_i32_14 : i32 to vector<1x8x1xi32>
    %40 = arith.cmpi eq, %0, %39 : vector<1x8x1xi32>
    %cst_15 = arith.constant -2.000000e+01 : f32
    %41 = vector.broadcast %cst_15 : f32 to vector<1x8x1xf32>
    %42 = arith.select %40, %41, %34 : vector<1x8x1xi1>, vector<1x8x1xf32>
    %c5_i32 = arith.constant 5 : i32
    %43 = vector.broadcast %c5_i32 : i32 to vector<1x8x1xi32>
    %44 = arith.cmpi eq, %0, %43 : vector<1x8x1xi32>
    %cst_16 = arith.constant 0.009765625 : f32
    %45 = vector.broadcast %cst_16 : f32 to vector<1x8x1xf32>
    %46 = arith.select %44, %45, %38 : vector<1x8x1xi1>, vector<1x8x1xf32>
    %c5_i32_17 = arith.constant 5 : i32
    %47 = vector.broadcast %c5_i32_17 : i32 to vector<1x8x1xi32>
    %48 = arith.cmpi eq, %0, %47 : vector<1x8x1xi32>
    %cst_18 = arith.constant 0.000000e+00 : f32
    %49 = vector.broadcast %cst_18 : f32 to vector<1x8x1xf32>
    %50 = arith.select %48, %49, %42 : vector<1x8x1xi1>, vector<1x8x1xf32>
    %c6_i32 = arith.constant 6 : i32
    %51 = vector.broadcast %c6_i32 : i32 to vector<1x8x1xi32>
    %52 = arith.cmpi eq, %0, %51 : vector<1x8x1xi32>
    %cst_19 = arith.constant 0.009765625 : f32
    %53 = vector.broadcast %cst_19 : f32 to vector<1x8x1xf32>
    %54 = arith.select %52, %53, %46 : vector<1x8x1xi1>, vector<1x8x1xf32>
    %c6_i32_20 = arith.constant 6 : i32
    %55 = vector.broadcast %c6_i32_20 : i32 to vector<1x8x1xi32>
    %56 = arith.cmpi eq, %0, %55 : vector<1x8x1xi32>
    %cst_21 = arith.constant 0.000000e+00 : f32
    %57 = vector.broadcast %cst_21 : f32 to vector<1x8x1xf32>
    %58 = arith.select %56, %57, %50 : vector<1x8x1xi1>, vector<1x8x1xf32>
    %c7_i32 = arith.constant 7 : i32
    %59 = vector.broadcast %c7_i32 : i32 to vector<1x8x1xi32>
    %60 = arith.cmpi eq, %0, %59 : vector<1x8x1xi32>
    %cst_22 = arith.constant 1.000000e+00 : f32
    %61 = vector.broadcast %cst_22 : f32 to vector<1x8x1xf32>
    %62 = arith.select %60, %61, %54 : vector<1x8x1xi1>, vector<1x8x1xf32>
    %c7_i32_23 = arith.constant 7 : i32
    %63 = vector.broadcast %c7_i32_23 : i32 to vector<1x8x1xi32>
    %64 = arith.cmpi eq, %0, %63 : vector<1x8x1xi32>
    %cst_24 = arith.constant 0.000000e+00 : f32
    %65 = vector.broadcast %cst_24 : f32 to vector<1x8x1xf32>
    %66 = arith.select %64, %65, %58 : vector<1x8x1xi1>, vector<1x8x1xf32>
    %c0 = arith.constant 0 : index
    %c0_25 = arith.constant 0 : index
    %c0_26 = arith.constant 0 : index
    %67 = vector.load %arg1[%c0, %c0_25, %c0_26] : memref<4x8x64xi16, #tpu.memory_space<vmem>>, vector<4x8x64xi16>
    %68 = arith.sitofp %67 : vector<4x8x64xi16> to vector<4x8x64xf32>
    %69 = vector.broadcast %62 : vector<1x8x1xf32> to vector<4x8x64xf32>
    %70 = arith.mulf %68, %69 : vector<4x8x64xf32>
    %71 = vector.broadcast %66 : vector<1x8x1xf32> to vector<4x8x64xf32>
    %72 = arith.addf %70, %71 : vector<4x8x64xf32>
    %c0_27 = arith.constant 0 : index
    %c0_28 = arith.constant 0 : index
    %c0_29 = arith.constant 0 : index
    %73 = vector.load %arg3[%c0_27, %c0_28, %c0_29] : memref<4x1x64xi32, #tpu.memory_space<vmem>>, vector<4x1x64xi32>
    %c0_i32_30 = arith.constant 0 : i32
    %74 = vector.broadcast %c0_i32_30 : i32 to vector<4x1x64xi32>
    %75 = arith.cmpi sgt, %73, %74 : vector<4x1x64xi32>
    %76 = vector.extract_strided_slice %72 {offsets = [0, 0, 0], sizes = [4, 1, 64], strides = [1, 1, 1]} : vector<4x8x64xf32> to vector<4x1x64xf32>
    %77 = vector.extract_strided_slice %72 {offsets = [0, 1, 0], sizes = [4, 1, 64], strides = [1, 1, 1]} : vector<4x8x64xf32> to vector<4x1x64xf32>
    %c0_31 = arith.constant 0 : index
    %c0_32 = arith.constant 0 : index
    %c0_33 = arith.constant 0 : index
    %78 = vector.load %arg2[%c0_31, %c0_32, %c0_33] : memref<4x64x2xi32, #tpu.memory_space<vmem>>, vector<4x64x2xi32>
    %79 = arith.sitofp %78 : vector<4x64x2xi32> to vector<4x64x2xf32>
    %80 = vector.extract_strided_slice %79 {offsets = [0, 0, 0], sizes = [4, 64, 1], strides = [1, 1, 1]} : vector<4x64x2xf32> to vector<4x64x1xf32>
    %cst_34 = arith.constant 0.1953125 : f32
    %81 = vector.broadcast %cst_34 : f32 to vector<4x64x1xf32>
    %82 = arith.mulf %80, %81 : vector<4x64x1xf32>
    %cst_35 = arith.constant -1.000000e+02 : f32
    %83 = vector.broadcast %cst_35 : f32 to vector<4x64x1xf32>
    %84 = arith.addf %82, %83 : vector<4x64x1xf32>
    %85 = vector.extract_strided_slice %79 {offsets = [0, 0, 1], sizes = [4, 64, 1], strides = [1, 1, 1]} : vector<4x64x2xf32> to vector<4x64x1xf32>
    %cst_36 = arith.constant 0.1953125 : f32
    %86 = vector.broadcast %cst_36 : f32 to vector<4x64x1xf32>
    %87 = arith.mulf %85, %86 : vector<4x64x1xf32>
    %cst_37 = arith.constant -1.000000e+02 : f32
    %88 = vector.broadcast %cst_37 : f32 to vector<4x64x1xf32>
    %89 = arith.addf %87, %88 : vector<4x64x1xf32>
    %90 = vector.broadcast %84 : vector<4x64x1xf32> to vector<4x64x64xf32>
    %91 = vector.broadcast %76 : vector<4x1x64xf32> to vector<4x64x64xf32>
    %92 = arith.subf %90, %91 : vector<4x64x64xf32>
    %93 = arith.mulf %92, %92 : vector<4x64x64xf32>
    %94 = vector.broadcast %89 : vector<4x64x1xf32> to vector<4x64x64xf32>
    %95 = vector.broadcast %77 : vector<4x1x64xf32> to vector<4x64x64xf32>
    %96 = arith.subf %94, %95 : vector<4x64x64xf32>
    %97 = arith.mulf %96, %96 : vector<4x64x64xf32>
    %98 = arith.addf %93, %97 : vector<4x64x64xf32>
    %99 = tpu.iota {dimensions = array<i32: 1>} : vector<1x64x64xi32>
    %100 = tpu.iota {dimensions = array<i32: 2>} : vector<1x64x64xi32>
    %101 = arith.cmpi slt, %100, %99 : vector<1x64x64xi32>
    %cst_38 = arith.constant 4.000000e+00 : f32
    %102 = vector.broadcast %cst_38 : f32 to vector<4x64x64xf32>
    %103 = arith.cmpf olt, %98, %102 : vector<4x64x64xf32>
    %104 = vector.broadcast %101 : vector<1x64x64xi1> to vector<4x64x64xi1>
    %105 = arith.andi %103, %104 : vector<4x64x64xi1>
    %106 = arith.extui %105 : vector<4x64x64xi1> to vector<4x64x64xi32>
    %107 = arith.sitofp %106 : vector<4x64x64xi32> to vector<4x64x64xf32>
    %108 = arith.truncf %107 : vector<4x64x64xf32> to vector<4x64x64xbf16>
    %109 = arith.extui %75 : vector<4x1x64xi1> to vector<4x1x64xi32>
    %110 = arith.sitofp %109 : vector<4x1x64xi32> to vector<4x1x64xf32>
    %111 = arith.truncf %110 : vector<4x1x64xf32> to vector<4x1x64xbf16>
    "tpu.trace_start"() <{level = 10 : i32, message = "bqj,bij->bqi"}> : () -> ()
    %cst_39 = arith.constant dense<0.000000e+00> : vector<4x1x64xf32>
    %112 = tpu.matmul %111, %108, %cst_39 {dimension_numbers = #tpu.dot_dimension_numbers<[2], [2], [1], [1], [0, 0, 0, 1, 1, 1], [0], [0]>} : vector<4x1x64xbf16>, vector<4x64x64xbf16>, vector<4x1x64xf32> -> vector<4x1x64xf32>
    %cst_40 = arith.constant 0.000000e+00 : f32
    "tpu.trace_stop"() : () -> ()
    %113 = vector.broadcast %cst_40 : f32 to vector<4x1x64xf32>
    %114 = arith.cmpf ogt, %112, %113 : vector<4x1x64xf32>
    %cst_41 = arith.constant dense<true> : vector<4x1x64xi1>
    %115 = arith.xori %114, %cst_41 : vector<4x1x64xi1>
    %116 = arith.andi %75, %115 : vector<4x1x64xi1>
    %cst_42 = arith.constant 0.000000e+00 : f32
    %117 = vector.shape_cast %116 : vector<4x1x64xi1> to vector<4x1x64xi1>
    %118 = vector.broadcast %117 : vector<4x1x64xi1> to vector<4x8x64xi1>
    %119 = vector.broadcast %cst_42 : f32 to vector<4x8x64xf32>
    %120 = arith.select %118, %72, %119 : vector<4x8x64xi1>, vector<4x8x64xf32>
    %c0_43 = arith.constant 0 : index
    %c0_44 = arith.constant 0 : index
    %c0_45 = arith.constant 0 : index
    %121 = vector.load %arg4[%c0_43, %c0_44, %c0_45] : memref<4x8x64xf32, #tpu.memory_space<vmem>>, vector<4x8x64xf32>
    tpu.vector_store %arg4[%c0_43, %c0_44, %c0_45], %120 {strides = array<i32>} : memref<4x8x64xf32, #tpu.memory_space<vmem>>, vector<4x8x64xf32>,
    %122 = arith.extui %116 : vector<4x1x64xi1> to vector<4x1x64xi32>
    %123 = vector.extract_strided_slice %122 {offsets = [0, 0, 0], sizes = [1, 1, 64], strides = [1, 1, 1]} : vector<4x1x64xi32> to vector<1x1x64xi32>
    %124 = vector.shape_cast %123 : vector<1x1x64xi32> to vector<1x64xi32>
    %c0_46 = arith.constant 0 : index
    %c0_47 = arith.constant 0 : index
    %125 = vector.load %arg5[%c0_46, %c0_47] : memref<4x64xi32, #tpu.memory_space<vmem>>, vector<1x64xi32>
    tpu.vector_store %arg5[%c0_46, %c0_47], %124 {strides = array<i32>} : memref<4x64xi32, #tpu.memory_space<vmem>>, vector<1x64xi32>,
    %126 = vector.extract_strided_slice %122 {offsets = [1, 0, 0], sizes = [1, 1, 64], strides = [1, 1, 1]} : vector<4x1x64xi32> to vector<1x1x64xi32>
    %127 = vector.shape_cast %126 : vector<1x1x64xi32> to vector<1x64xi32>
    %c1 = arith.constant 1 : index
    %c0_48 = arith.constant 0 : index
    %128 = vector.load %arg5[%c1, %c0_48] : memref<4x64xi32, #tpu.memory_space<vmem>>, vector<1x64xi32>
    tpu.vector_store %arg5[%c1, %c0_48], %127 {strides = array<i32>} : memref<4x64xi32, #tpu.memory_space<vmem>>, vector<1x64xi32>,
    %129 = vector.extract_strided_slice %122 {offsets = [2, 0, 0], sizes = [1, 1, 64], strides = [1, 1, 1]} : vector<4x1x64xi32> to vector<1x1x64xi32>
    %130 = vector.shape_cast %129 : vector<1x1x64xi32> to vector<1x64xi32>
    %c2 = arith.constant 2 : index
    %c0_49 = arith.constant 0 : index
    %131 = vector.load %arg5[%c2, %c0_49] : memref<4x64xi32, #tpu.memory_space<vmem>>, vector<1x64xi32>
    tpu.vector_store %arg5[%c2, %c0_49], %130 {strides = array<i32>} : memref<4x64xi32, #tpu.memory_space<vmem>>, vector<1x64xi32>,
    %132 = vector.extract_strided_slice %122 {offsets = [3, 0, 0], sizes = [1, 1, 64], strides = [1, 1, 1]} : vector<4x1x64xi32> to vector<1x1x64xi32>
    %133 = vector.shape_cast %132 : vector<1x1x64xi32> to vector<1x64xi32>
    %c3 = arith.constant 3 : index
    %c0_50 = arith.constant 0 : index
    %134 = vector.load %arg5[%c3, %c0_50] : memref<4x64xi32, #tpu.memory_space<vmem>>, vector<1x64xi32>
    tpu.vector_store %arg5[%c3, %c0_50], %133 {strides = array<i32>} : memref<4x64xi32, #tpu.memory_space<vmem>>, vector<1x64xi32>,
    return
  }
  func.func @transform_0(%arg0: i32) -> (i32, i32, i32) {
    %c0_i32 = arith.constant 0 : i32
    %c0_i32_0 = arith.constant 0 : i32
    %c0_i32_1 = arith.constant 0 : i32
    return %arg0, %c0_i32, %c0_i32_0 : i32, i32, i32
  }
  func.func @transform_1(%arg0: i32) -> (i32, i32, i32) {
    %c0_i32 = arith.constant 0 : i32
    %c0_i32_0 = arith.constant 0 : i32
    %c0_i32_1 = arith.constant 0 : i32
    return %arg0, %c0_i32, %c0_i32_0 : i32, i32, i32
  }
  func.func @transform_2(%arg0: i32) -> (i32, i32, i32) {
    %c0_i32 = arith.constant 0 : i32
    %c0_i32_0 = arith.constant 0 : i32
    %c0_i32_1 = arith.constant 0 : i32
    return %arg0, %c0_i32, %c0_i32_0 : i32, i32, i32
  }
  func.func @transform_3(%arg0: i32) -> (i32, i32, i32) {
    %c0_i32 = arith.constant 0 : i32
    %c0_i32_0 = arith.constant 0 : i32
    %c0_i32_1 = arith.constant 0 : i32
    return %arg0, %c0_i32, %c0_i32_0 : i32, i32, i32
  }
  func.func @transform_4(%arg0: i32) -> (i32, i32) {
    %c0_i32 = arith.constant 0 : i32
    %c0_i32_0 = arith.constant 0 : i32
    return %arg0, %c0_i32 : i32, i32
  }
}

</mosaic_0001>

<bundles_post_ra>
// kernel: tpu_custom_call.1
= control target key start
LH: loop header
LB: loop body
LE: loop exit
PB: predicated region body
PF: predicated region fallthrough
CT: control target
= control target key end

     0   :  { %10 = vsyncpa [#allocation3], 0  ;;  %v2002_v3 = vmov 0   ;;  %s1997_s0 = inlined_call_operand.vmem [shape: s16[4,8,64], index: 0, kind: input, shape index: {}]   ;;  %s1998_s1 = inlined_call_operand.vmem [shape: s32[4,64,2], index: 1, kind: input, shape index: {}]   ;;  %s1999_s2 = inlined_call_operand.vmem [shape: s32[4,1,64], index: 2, kind: input, shape index: {}]   ;;  %s2000_s3 = inlined_call_operand.hbm [shape: f32[4,8,64], index: 3, kind: output, shape index: {0}]   ;;  %s2001_s4 = inlined_call_operand.hbm [shape: s32[4,64], index: 4, kind: output, shape index: {1}]  }
   0x1   :  { %v77_v0 = vld [vmem:[%s1998_s1 + $0x20] sm:$0xff]  ;;  %v75_v1 = vld [vmem:[%s1998_s1 + $0x10] sm:$0xff]  ;;  %1185 = vset.pattern.permute.xlu2 %v2002_v3  ;;  %1184 = vset.pattern.permute.xlu1 %v2002_v3  ;;  %v78_v7 = vld [vmem:[%s1998_s1 + $0x28] sm:$0xff] }
   0x2   :  { %v73_v2 = vld [vmem:[%s1998_s1] sm:$0xff]  ;;  %v109_v4 = vcvt.s32.f32 %v77_v0  ;;  %v107_v5 = vcvt.s32.f32 %v75_v1  ;;  %v76_v8 = vld [vmem:[%s1998_s1 + $0x18] sm:$0xff]  ;;  %v74_v9 = vld [vmem:[%s1998_s1 + $0x8] sm:$0xff]  ;;  %1183 = vset.pattern.permute.xlu0 %v2002_v3  ;;  %v110_v10 = vcvt.s32.f32 %v78_v7 }
   0x3   :  { %v105_v6 = vcvt.s32.f32 %v73_v2  ;;  %v108_v14 = vcvt.s32.f32 %v76_v8  ;;  %v106_v15 = vcvt.s32.f32 %v74_v9 }
   0x4   :  { %v141_v11 = vmul.f32 0.1953125, %v109_v4  ;;  %v139_v12 = vmul.f32 0.1953125, %v107_v5 }
   0x5   :  { %v137_v13 = vmul.f32 0.1953125, %v105_v6 }
   0x6   :  { %v1299_v16 = vadd.f32 -100.0, %v141_v11  ;;  %v1301_v17 = vadd.f32 -100.0, %v139_v12 }
   0x7   :  { %v1303_v18 = vadd.f32 -100.0, %v137_v13 }
   0x8   :  { %11 = vsyncpa [#allocation5], 0  ;;  %223 = vperm.xlu2 %1185, %v1299_v16   ;;  %213 = vperm.xlu1 %1184, %v1301_v17   ;;  %v142_v19 = vmul.f32 0.1953125, %v110_v10  ;;  %v140_v20 = vmul.f32 0.1953125, %v108_v14  ;;  %v138_v21 = vmul.f32 0.1953125, %v106_v15  ;;  %v81_v22 = vld [vmem:[%s1998_s1 + $0x40] sm:$0xff] }
   0x9   :  { %203 = vperm.xlu0 %1183, %v1303_v18   ;;  %v80_v23 = vld [vmem:[%s1998_s1 + $0x38] sm:$0xff]  ;;  %v79_v24 = vld [vmem:[%s1998_s1 + $0x30] sm:$0xff]  ;;  %v113_v27 = vcvt.s32.f32 %v81_v22  ;;  %v82_v36 = vld [vmem:[%s1998_s1 + $0x48] sm:$0xff]  ;;  %s1112_s14 = sshll.u32 %s2001_s4, 4  ;;  %s1250_s15 = smov [#allocation2]   ;;  %s1113_s14 = int_to_ptr.hbm [resolvable:$true] %s1112_s14 }
   0xa   :  { %v1317_v25 = vadd.f32 -100.0, %v142_v19  ;;  %v1319_v26 = vadd.f32 -100.0, %v140_v20  ;;  %v112_v28 = vcvt.s32.f32 %v80_v23  ;;  %v1321_v29 = vadd.f32 -100.0, %v138_v21  ;;  %v84_v34 = vld [vmem:[%s1998_s1 + $0x58] sm:$0xff]  ;;  %v83_v35 = vld [vmem:[%s1998_s1 + $0x50] sm:$0xff]  ;;  %v86_v47 = vld [vmem:[%s1998_s1 + $0x68] sm:$0xff] }
   0xb   :  { %v111_v30 = vcvt.s32.f32 %v79_v24  ;;  %v145_v31 = vmul.f32 0.1953125, %v113_v27  ;;  %v116_v39 = vcvt.s32.f32 %v84_v34  ;;  %v115_v40 = vcvt.s32.f32 %v83_v35  ;;  %v87_v46 = vld [vmem:[%s1998_s1 + $0x70] sm:$0xff]  ;;  %v85_v48 = vld [vmem:[%s1998_s1 + $0x60] sm:$0xff]  ;;  %v90_v58 = vld [vmem:[%s1998_s1 + $0x88] sm:$0xff]  ;;  %s1096_s16 = sshll.u32 %s1250_s15, 4  ;;  %s1098_s19 = sshll.u32 %s2000_s3, 4  ;;  %s1097_s16 = int_to_ptr.vmem [resolvable:$true] %s1096_s16  ;;  %s1099_s19 = int_to_ptr.hbm [resolvable:$true] %s1098_s19 }
   0xc   :  { %v144_v32 = vmul.f32 0.1953125, %v112_v28  ;;  %v114_v42 = vcvt.s32.f32 %v82_v36  ;;  %v119_v51 = vcvt.s32.f32 %v87_v46  ;;  %v118_v52 = vcvt.s32.f32 %v86_v47  ;;  %v89_v59 = vld [vmem:[%s1998_s1 + $0x80] sm:$0xff]  ;;  %v88_v60 = vld [vmem:[%s1998_s1 + $0x78] sm:$0xff]  ;;  %v91_v9 = vld [vmem:[%s1998_s1 + $0x90] sm:$0xff]  ;;  %s1251_s3 = smov 128   ;;  %s1252_s4 = smov 8  }
   0xd   :  { %v143_v33 = vmul.f32 0.1953125, %v111_v30  ;;  %v1335_v37 = vadd.f32 -100.0, %v145_v31  ;;  %v148_v43 = vmul.f32 0.1953125, %v116_v39  ;;  %v147_v44 = vmul.f32 0.1953125, %v115_v40  ;;  %v93_v7 = vld [vmem:[%s1998_s1 + $0xa0] sm:$0xff]  ;;  %v92_v8 = vld [vmem:[%s1998_s1 + $0x98] sm:$0xff] }
   0xe   :  { %v1337_v38 = vadd.f32 -100.0, %v144_v32  ;;  %v146_v45 = vmul.f32 0.1953125, %v114_v42  ;;  %v117_v54 = vcvt.s32.f32 %v85_v48  ;;  %v151_v55 = vmul.f32 0.1953125, %v119_v51  ;;  %v96_v22 = vld [vmem:[%s1998_s1 + $0xb8] sm:$0xff]  ;;  %v95_v23 = vld [vmem:[%s1998_s1 + $0xb0] sm:$0xff]  ;;  %v94_v24 = vld [vmem:[%s1998_s1 + $0xa8] sm:$0xff] }
   0xf   :  { %v1339_v41 = vadd.f32 -100.0, %v143_v33  ;;  %v1353_v49 = vadd.f32 -100.0, %v148_v43  ;;  %v1355_v50 = vadd.f32 -100.0, %v147_v44  ;;  %v150_v56 = vmul.f32 0.1953125, %v118_v52  ;;  %v99_v39 = vld [vmem:[%s1998_s1 + $0xd0] sm:$0xff]  ;;  %v98_v40 = vld [vmem:[%s1998_s1 + $0xc8] sm:$0xff] }
  0x10   :  { %228 = vperm.xlu2 %1185, %v1317_v25   ;;  %218 = vperm.xlu1 %1184, %v1319_v26   ;;  %v1357_v53 = vadd.f32 -100.0, %v146_v45  ;;  %v149_v57 = vmul.f32 0.1953125, %v117_v54  ;;  %v1371_v61 = vadd.f32 -100.0, %v151_v55  ;;  %v122_v63 = vcvt.s32.f32 %v90_v58  ;;  %v97_v42 = vld [vmem:[%s1998_s1 + $0xc0] sm:$0xff]  ;;  %v104_v55 = vld [vmem:[%s1998_s1 + $0xf8] sm:$0xff] }
  0x11   :  { %208 = vperm.xlu0 %1183, %v1321_v29   ;;  %v1373_v62 = vadd.f32 -100.0, %v150_v56  ;;  %v121_v0 = vcvt.s32.f32 %v89_v59  ;;  %v120_v2 = vcvt.s32.f32 %v88_v60  ;;  %v125_v12 = vcvt.s32.f32 %v93_v7  ;;  %v103_v56 = vld [vmem:[%s1998_s1 + $0xf0] sm:$0xff] }
  0x12   :  { %v1375_v1 = vadd.f32 -100.0, %v149_v57  ;;  %v154_v4 = vmul.f32 0.1953125, %v122_v63  ;;  %v124_v13 = vcvt.s32.f32 %v92_v8  ;;  %v123_v15 = vcvt.s32.f32 %v91_v9 }
  0x13   :  { %v153_v5 = vmul.f32 0.1953125, %v121_v0  ;;  %v152_v6 = vmul.f32 0.1953125, %v120_v2  ;;  %v157_v19 = vmul.f32 0.1953125, %v125_v12  ;;  %v128_v30 = vcvt.s32.f32 %v96_v22 }
  0x14   :  { %v1389_v10 = vadd.f32 -100.0, %v154_v4  ;;  %v156_v20 = vmul.f32 0.1953125, %v124_v13  ;;  %v155_v21 = vmul.f32 0.1953125, %v123_v15  ;;  %v127_v31 = vcvt.s32.f32 %v95_v23 }
  0x15   :  { %v1391_v11 = vadd.f32 -100.0, %v153_v5  ;;  %v1393_v14 = vadd.f32 -100.0, %v152_v6  ;;  %v1407_v27 = vadd.f32 -100.0, %v157_v19  ;;  %v126_v33 = vcvt.s32.f32 %v94_v24  ;;  %v102_v6 = vld [vmem:[%s1998_s1 + $0xe8] sm:$0xff] }
  0x16   :  { %v1409_v28 = vadd.f32 -100.0, %v156_v20  ;;  %v1411_v32 = vadd.f32 -100.0, %v155_v21  ;;  %v160_v34 = vmul.f32 0.1953125, %v128_v30  ;;  %v159_v35 = vmul.f32 0.1953125, %v127_v31 }
  0x17   :  { %v158_v36 = vmul.f32 0.1953125, %v126_v33  ;;  %v131_v45 = vcvt.s32.f32 %v99_v39  ;;  %v130_v46 = vcvt.s32.f32 %v98_v40  ;;  %v129_v48 = vcvt.s32.f32 %v97_v42 }
  0x18   :  { %243 = vperm.xlu2 %1185, %v1335_v37   ;;  %238 = vperm.xlu1 %1184, %v1337_v38   ;;  %v1425_v43 = vadd.f32 -100.0, %v160_v34  ;;  %v191_v44 = vadd.f32 -100.0, %v159_v35  ;;  %v136_v59 = vcvt.s32.f32 %v104_v55  ;;  %v19_v60 = vlaneseq  ;;  %v1167_v35 = vld [vmem:[%s1997_s0] sm:$0xff]  }
  0x19   :  { %233 = vperm.xlu0 %1183, %v1339_v41   ;;  %v1427_v47 = vadd.f32 -100.0, %v158_v36  ;;  %v163_v51 = vmul.f32 0.1953125, %v131_v45  ;;  %v162_v52 = vmul.f32 0.1953125, %v130_v46  ;;  %v161_v54 = vmul.f32 0.1953125, %v129_v48  ;;  %v101_v36 = vld [vmem:[%s1998_s1 + $0xe0] sm:$0xff] }
  0x1a   :  { %v135_v0 = vcvt.s32.f32 %v103_v56  ;;  %v168_v2 = vmul.f32 0.1953125, %v136_v59  ;;  %v1446_v4 = vshrl.u32 %v19_v60, 7  ;;  %v134_v9 = vcvt.s32.f32 %v102_v6 }
  0x1b   :  { %v1437_v57 = vadd.f32 -100.0, %v163_v51  ;;  %v1439_v58 = vadd.f32 -100.0, %v162_v52  ;;  %v1441_v63 = vadd.f32 -100.0, %v161_v54  ;;  %v1246_v12 = vmov 0.0  }
  0x1c   :  { %v167_v5 = vmul.f32 0.1953125, %v135_v0  ;;  %v200_v7 = vadd.f32 -100.0, %v168_v2  ;;  %vm21_vm0 = vcmp.eq.s32.totalorder %v1446_v4, 0  ;;  %vm24_vm1 = vcmp.eq.s32.totalorder %v1446_v4, 1 }
  0x1d   :  { %v22_v13 = vsel %vm21_vm0, 0.1953125, %v1246_v12  ;;  %v1247_v15 = vmov 1   ;;  %v166_v19 = vmul.f32 0.1953125, %v134_v9  ;;  %vm27_vm2 = vcmp.eq.s32.totalorder %v1446_v4, 2 }
  0x1e   :  { %v199_v8 = vadd.f32 -100.0, %v167_v5  ;;  %v25_v20 = vsel %vm24_vm1, 0.1953125, %v22_v13  ;;  %v23_v21 = vsel %vm21_vm0, -100.0, %v1246_v12  ;;  %vm30_vm3 = vcmp.eq.s32.totalorder %v1446_v4, 3 }
  0x1f   :  { %v1458_v22 = vadd.f32 -100.0, %v166_v19  ;;  %v28_v23 = vsel %vm27_vm2, 0.0061359233, %v25_v20  ;;  %v26_v24 = vsel %vm24_vm1, -100.0, %v23_v21  ;;  %vm33_vm4 = vcmp.eq.s32.totalorder %v1446_v4, 4 }
  0x20   :  { %258 = vperm.xlu2 %1185, %v1353_v49   ;;  %253 = vperm.xlu1 %1184, %v1355_v50   ;;  %v31_v30 = vsel %vm30_vm3, 0.0390625, %v28_v23  ;;  %v29_v31 = vsel %vm27_vm2, -3.1415927, %v26_v24  ;;  %vm36_vm5 = vcmp.eq.s32.totalorder %v1446_v4, 5  ;;  %vm39_vm6 = vcmp.eq.s32.totalorder %v1446_v4, 6 }
  0x21   :  { %248 = vperm.xlu0 %1183, %v1357_v53   ;;  %v34_v33 = vsel %vm33_vm4, 0.0390625, %v31_v30  ;;  %v32_v34 = vsel %vm30_vm3, -20.0, %v29_v31  ;;  %v133_v42 = vcvt.s32.f32 %v101_v36  ;;  %vm42_vm7 = vcmp.eq.s32.totalorder %v1446_v4, 7 }
  0x22   :  { %v37_v39 = vsel %vm36_vm5, 0.009765625, %v34_v33  ;;  %v35_v40 = vsel %vm33_vm4, -20.0, %v32_v34  ;;  %vm882_vm2 = vcmask 523264  }
  0x23   :  { %v40_v45 = vsel %vm39_vm6, 0.009765625, %v37_v39  ;;  %v38_v48 = vsel %vm36_vm5, 0.0, %v35_v40  ;;  %v165_v51 = vmul.f32 0.1953125, %v133_v42 }
  0x24   :  { %v1483_v54 = vsel %vm42_vm7, 1.0, %v40_v45  ;;  %v41_v55 = vsel %vm39_vm6, 0.0, %v38_v48 }
  0x25   :  { %v197_v56 = vadd.f32 -100.0, %v165_v51  ;;  %v1486_v59 = vsel %vm42_vm7, 0.0, %v41_v55 }
  0x28   :  { %273 = vperm.xlu2 %1185, %v1371_v61   ;;  %268 = vperm.xlu1 %1184, %v1373_v62  }
  0x29   :  { %263 = vperm.xlu0 %1183, %v1375_v1  }
  0x30   :  { %288 = vperm.xlu2 %1185, %v1389_v10   ;;  %283 = vperm.xlu1 %1184, %v1391_v11  }
  0x31   :  { %278 = vperm.xlu0 %1183, %v1393_v14  }
  0x38   :  { %303 = vperm.xlu2 %1185, %v1407_v27   ;;  %298 = vperm.xlu1 %1184, %v1409_v28  }
  0x39   :  { %293 = vperm.xlu0 %1183, %v1411_v32  }
  0x40   :  { %318 = vperm.xlu2 %1185, %v1425_v43   ;;  %313 = vperm.xlu1 %1184, %v191_v44  }
  0x41   :  { %308 = vperm.xlu0 %1183, %v1427_v47  }
  0x48   :  { %333 = vperm.xlu2 %1185, %v1437_v57   ;;  %328 = vperm.xlu1 %1184, %v1439_v58  }
  0x49   :  { %323 = vperm.xlu0 %1183, %v1441_v63  }
  0x50   :  { %1186 = vset.pattern.permute.xlu2 %v1247_v15  ;;  %358 = vperm.xlu1 %1184, %v200_v7  }
  0x51   :  { %353 = vperm.xlu0 %1183, %v199_v8   ;;  %518 = vperm.xlu2 %1186, %v191_v44   ;;  %v1169_v44 = vunpack.c.h.b16 %v1167_v35 }
  0x53   :  { %v54_v52 = vcvt.s32.f32 %v1169_v44 }
  0x58   :  { %1187 = vset.pattern.permute.xlu1 %v1247_v15 }
  0x59   :  { %348 = vperm.xlu0 %1183, %v1458_v22   ;;  %554 = vperm.xlu2 %1186, %v200_v7  }
  0x5a   :  { %550 = vperm.xlu1 %1187, %v199_v8  }
  0x61   :  { %1189 = vset.pattern.permute.xlu0 %v1247_v15  ;;  %458 = vperm.xlu2 %1186, %v1337_v38   ;;  %v58_v38 = vmul.f32 %v54_v52, %v1483_v54 }
  0x62   :  { %454 = vperm.xlu1 %1187, %v1339_v41   ;;  %522 = vperm.xlu0 %1189, %v1425_v43   ;;  %v1479_v46 = vpop.permute.xlu2 %223  ;;  %v1168_v41 = vunpack.c.l.b16 %v1167_v35 }
  0x63   :  { %v1494_v0 = vadd.f32 %v58_v38, %v1486_v59 }
  0x64   :  { %v53_v2 = vcvt.s32.f32 %v1168_v41 }
  0x65   :  { %v1497_v5 = vperm.slane %v1494_v0, 0 }
  0x66   :  { %v57_v6 = vmul.f32 %v53_v2, %v1483_v54 }
  0x68   :  { %v1511_v8 = vadd.f32 %v57_v6, %v1486_v59 }
  0x69   :  { %1188 = vset.pattern.permute.xlu2 %v2002_v3 }
  0x6a   :  { %490 = vperm.xlu1 %1187, %v1393_v14   ;;  %486 = vperm.xlu0 %1189, %v1371_v61   ;;  %v1491_v43 = vpop.permute.xlu2 %228  ;;  %v100_v14 = vld [vmem:[%s1998_s1 + $0xd8] sm:$0xff]  ;;  %2005 = vst [vmem:[#allocation8_spill] sm:$0xff] %v1511_v8  ;;  %v1603_v41 = vperm.slane %v1511_v8, 1 }
  0x6b   :  { %343 = vperm.xlu2 %1188, %v197_v56   ;;  %v132_v9 = vcvt.s32.f32 %v100_v14 }
  0x6d   :  { %v164_v19 = vmul.f32 0.1953125, %v132_v9 }
  0x72   :  { %510 = vperm.xlu1 %1187, %v1407_v27   ;;  %446 = vperm.xlu0 %1189, %v1299_v16   ;;  %v244_v7 = vpop.permute.xlu2 %243  ;;  %v1514_v27 = vperm.slane %v1511_v8, 0 }
  0x73   :  { %1190 = vset.pattern.permute.xlu2 %v1247_v15  ;;  %v1504_v61 = vsub.f32 %v244_v7, %v1497_v5 }
  0x74   :  { %514 = vperm.xlu2 %1190, %v1427_v47   ;;  %v196_v47 = vadd.f32 -100.0, %v164_v19 }
  0x7a   :  { %542 = vperm.xlu1 %1187, %v197_v56   ;;  %502 = vperm.xlu0 %1189, %v1411_v32   ;;  %v1517_v16 = vpop.permute.xlu2 %258  ;;  %v1519_v13 = vpop.permute.xlu1 %213 }
  0x7b   :  { %v204_v20 = vpop.permute.xlu0 %203 }
  0x7c   :  { %v1522_v21 = vsub.f32 %v204_v20, %v1514_v27  ;;  %546 = vperm.xlu2 %1190, %v1458_v22  }
  0x82   :  { %450 = vperm.xlu1 %1187, %v1317_v25   ;;  %538 = vperm.xlu0 %1189, %v196_v47   ;;  %v1526_v23 = vpop.permute.xlu2 %273  ;;  %v1528_v24 = vpop.permute.xlu1 %218 }
  0x83   :  { %v209_v32 = vpop.permute.xlu0 %208 }
  0x84   :  { %v1531_v30 = vsub.f32 %v209_v32, %v1514_v27  ;;  %478 = vperm.xlu2 %1190, %v1375_v1  }
  0x8a   :  { %482 = vperm.xlu1 %1187, %v1373_v62   ;;  %470 = vperm.xlu0 %1189, %v1355_v50   ;;  %v1536_v31 = vpop.permute.xlu2 %288  ;;  %v239_v22 = vpop.permute.xlu1 %238 }
  0x8b   :  { %v1538_v33 = vpop.permute.xlu0 %233 }
  0x8c   :  { %1191 = vset.pattern.permute.xlu2 %v2002_v3 }
  0x8d   :  { %338 = vperm.xlu2 %1191, %v196_v47  }
  0x92   :  { %506 = vperm.xlu1 %1187, %v1409_v28   ;;  %498 = vperm.xlu0 %1189, %v1389_v10   ;;  %v1543_v25 = vpop.permute.xlu2 %303  ;;  %v1545_v34 = vpop.permute.xlu1 %253 }
  0x93   :  { %v249_v1 = vpop.permute.xlu0 %248 }
  0x94   :  { %v1548_v62 = vsub.f32 %v249_v1, %v1497_v5  ;;  %v372_v1 = vsub.f32 %v239_v22, %v1514_v27 }
  0x95   :  { %1192 = vset.pattern.permute.xlu2 %v1247_v15 }
  0x96   :  { %534 = vperm.xlu2 %1192, %v1437_v57  }
  0x9a   :  { %438 = vperm.xlu1 %1187, %v1301_v17   ;;  %430 = vperm.xlu0 %1189, %v1303_v18   ;;  %v1554_v50 = vpop.permute.xlu2 %318  ;;  %v1556_v28 = vpop.permute.xlu1 %268 }
  0x9b   :  { %v1558_v10 = vpop.permute.xlu0 %263 }
  0x9e   :  { %442 = vperm.xlu2 %1192, %v1319_v26   ;;  %v1174_v26 = vld [vmem:[%s1997_s0 + $0x8] sm:$0xff]  }
  0xa2   :  { %474 = vperm.xlu1 %1187, %v1353_v49   ;;  %466 = vperm.xlu0 %1189, %v1357_v53   ;;  %v1563_v35 = vpop.permute.xlu2 %333  ;;  %v1565_v15 = vpop.permute.xlu1 %283  ;;  %v1173_v49 = vunpack.c.h.b16 %v1174_v26 }
  0xa3   :  { %v1567_v57 = vpop.permute.xlu0 %278 }
  0xa4   :  { %v56_v39 = vcvt.s32.f32 %v1173_v49  ;;  %v1622_v49 = vand.u32 127, %v19_v60 }
  0xa6   :  { %494 = vperm.xlu2 %1192, %v1391_v11   ;;  %v60_v42 = vmul.f32 %v56_v39, %v1483_v54 }
  0xa8   :  { %v1587_v48 = vadd.f32 %v60_v42, %v1486_v59 }
  0xaa   :  { %526 = vperm.xlu1 %1187, %v1441_v63   ;;  %v1571_v17 = vpop.permute.xlu1 %298  ;;  %v1172_v63 = vunpack.c.l.b16 %v1174_v26  ;;  %v1596_v55 = vperm.slane %v1587_v48, 0  ;;  %v1619_v26 = vadd.s32 56, %v1446_v4 }
  0xab   :  { %v1573_v18 = vpop.permute.xlu0 %293  ;;  %v519_v36 = vpop.permute.xlu2 %518 }
  0xac   :  { %v55_v44 = vcvt.s32.f32 %v1172_v63  ;;  %vm673_vm9 = vcmp.lt.s32.totalorder %v1622_v49, %v1619_v26  ;;  %v1702_v26 = vadd.s32 32, %v1446_v4 }
  0xae   :  { %530 = vperm.xlu2 %1192, %v1439_v58   ;;  %v59_v52 = vmul.f32 %v55_v44, %v1483_v54 }
  0xb0   :  { %v1600_v56 = vadd.f32 %v59_v52, %v1486_v59 }
  0xb2   :  { %434 = vperm.xlu1 %1187, %v1321_v29   ;;  %v314_v53 = vpop.permute.xlu1 %313  ;;  %v1592_v29 = vperm.slane %v1587_v48, 1  ;;  %v1607_v7 = vperm.slane %v1600_v56, 1  ;;  %v1612_v19 = vperm.slane %v1600_v56, 0 }
  0xb3   :  { %v1580_v40 = vpop.permute.xlu0 %308  ;;  %v555_v11 = vpop.permute.xlu2 %554 }
  0xb4   :  { %v583_v47 = vsub.f32 %v519_v36, %v1607_v7  ;;  %v387_v32 = vsub.f32 %v314_v53, %v1612_v19  ;;  %v404_v36 = vmul.f32 %v372_v1, %v372_v1  ;;  %v1634_v53 = vadd.s32 48, %v1446_v4 }
  0xb6   :  { %462 = vperm.xlu2 %1192, %v1335_v37   ;;  %v592_v37 = vsub.f32 %v555_v11, %v1592_v29  ;;  %v615_v42 = vmul.f32 %v583_v47, %v583_v47  ;;  %v419_v44 = vmul.f32 %v387_v32, %v387_v32  ;;  %vm672_vm11 = vcmp.lt.s32.totalorder %v1622_v49, %v1634_v53 }
  0xb8   :  { %v624_v14 = vmul.f32 %v592_v37, %v592_v37 }
  0xba   :  { %v1584_v45 = vpop.permute.xlu1 %328 }
  0xbb   :  { %v1589_v58 = vpop.permute.xlu0 %323  ;;  %v459_v51 = vpop.permute.xlu2 %458 }
  0xbc   :  { %v568_v59 = vsub.f32 %v459_v51, %v1603_v41 }
  0xbe   :  { %v600_v39 = vmul.f32 %v568_v59, %v568_v59  ;;  %v388_v59 = vsub.f32 %v1554_v50, %v1612_v19  ;;  %v379_v50 = vsub.f32 %v1526_v23, %v1497_v5 }
  0xc0   :  { %v632_v52 = vadd.f32 %v600_v39, %v404_v36  ;;  %v380_v36 = vsub.f32 %v1567_v57, %v1497_v5 }
  0xc2   :  { %v359_v38 = vpop.permute.xlu1 %358  ;;  %vm681_vm12 = vcmp.lt.f32.partialorder %v632_v52, 4.0 }
  0xc3   :  { %v396_v2 = vsub.f32 %v359_v38, %v1596_v55  ;;  %v354_v6 = vpop.permute.xlu0 %353  ;;  %vm729_vm0 = vmand %vm681_vm12, %vm673_vm9 }
  0xc4   :  { %v395_v11 = vsub.f32 %v354_v6, %v1596_v55  ;;  %v1133_v57 = vsel %vm729_vm0, 1.0, %v1246_v12 }
  0xc5   :  { %v428_v54 = vmul.f32 %v396_v2, %v396_v2  ;;  %v1609_v9 = vpop.permute.xlu2 %343  ;;  %v647_v2 = vadd.f32 %v615_v42, %v419_v44  ;;  %v420_v42 = vmul.f32 %v388_v59, %v388_v59 }
  0xc6   :  { %v427_v37 = vmul.f32 %v395_v11, %v395_v11 }
  0xc7   :  { %v656_v20 = vadd.f32 %v624_v14, %v428_v54  ;;  %v371_v54 = vsub.f32 %v1538_v33, %v1514_v27  ;;  %vm696_vm14 = vcmp.lt.f32.partialorder %v647_v2, 4.0 }
  0xc8   :  { %vm744_vm1 = vmand %vm696_vm14, %vm672_vm11 }
  0xc9   :  { %vm705_vm8 = vcmp.lt.f32.partialorder %v656_v20, 4.0  ;;  %v403_v11 = vmul.f32 %v371_v54, %v371_v54  ;;  %v1148_v2 = vsel %vm744_vm1, 1.0, %v1246_v12 }
  0xca   :  { %vm753_vm10 = vmand %vm705_vm8, %vm673_vm9 }
  0xcb   :  { %v1625_v63 = vpop.permute.xlu0 %348  ;;  %v1157_v14 = vsel %vm753_vm10, 1.0, %v1246_v12 }
  0xcc   :  { %v551_v51 = vpop.permute.xlu1 %550  ;;  %v849_v32 = vpack.c.bf16 %v1157_v14, %v1157_v14 }
  0xcd   :  { %v591_v22 = vsub.f32 %v551_v51, %v1592_v29 }
  0xce   :  { %v515_v60 = vpop.permute.xlu2 %514  ;;  %v1022_v14 = vunpack.c.l.b16 %v849_v32 }
  0xcf   :  { %v623_v38 = vmul.f32 %v591_v22, %v591_v22  ;;  %v582_v22 = vsub.f32 %v515_v60, %v1607_v7 }
  0xd1   :  { %v655_v6 = vadd.f32 %v623_v38, %v427_v37  ;;  %v386_v37 = vsub.f32 %v1580_v40, %v1612_v19  ;;  %v1664_v38 = vperm.slane %v1494_v0, 1  ;;  %v614_v60 = vmul.f32 %v582_v22, %v582_v22 }
  0xd2   :  { %v1679_v22 = vadd.s32 40, %v1446_v4 }
  0xd3   :  { %vm704_vm13 = vcmp.lt.f32.partialorder %v655_v6, 4.0 }
  0xd4   :  { %vm752_vm15 = vmand %vm704_vm13, %vm672_vm11  ;;  %v455_v20 = vpop.permute.xlu1 %454  ;;  %v523_v47 = vpop.permute.xlu0 %522  ;;  %vm671_vm7 = vcmp.lt.s32.totalorder %v1622_v49, %v1679_v22 }
  0xd5   :  { %v567_v1 = vsub.f32 %v455_v20, %v1603_v41  ;;  %v584_v33 = vsub.f32 %v523_v47, %v1607_v7  ;;  %v1156_v39 = vsel %vm752_vm15, 1.0, %v1246_v12  ;;  %v411_v47 = vmul.f32 %v379_v50, %v379_v50 }
  0xd6   :  { %v547_v44 = vpop.permute.xlu2 %546  ;;  %v848_v51 = vpack.c.bf16 %v1156_v39, %v1156_v39 }
  0xd7   :  { %v599_v52 = vmul.f32 %v567_v1, %v567_v1  ;;  %v616_v23 = vmul.f32 %v584_v33, %v584_v33  ;;  %v412_v1 = vmul.f32 %v380_v36, %v380_v36  ;;  %v418_v33 = vmul.f32 %v386_v37, %v386_v37 }
  0xd8   :  { %v1021_v6 = vunpack.c.l.b16 %v848_v51  ;;  %v840_v36 = vpack.c.bf16 %v1148_v2, %v1148_v2 }
  0xd9   :  { %v631_v54 = vadd.f32 %v599_v52, %v403_v11  ;;  %v648_v59 = vadd.f32 %v616_v23, %v420_v42  ;;  %v825_v11 = vpack.c.bf16 %v1133_v57, %v1133_v57  ;;  %v590_v52 = vsub.f32 %v547_v44, %v1592_v29 }
  0xda   :  { %v1026_v20 = vpack.c.b16 %v1022_v14, %v1021_v6  ;;  %v646_v6 = vadd.f32 %v614_v60, %v418_v33  ;;  %v973_v8 = vunpack.c.l.b16 %v840_v36 }
  0xdb   :  { %vm680_vm3 = vcmp.lt.f32.partialorder %v631_v54, 4.0  ;;  %vm697_vm4 = vcmp.lt.f32.partialorder %v648_v59, 4.0  ;;  %v622_v60 = vmul.f32 %v590_v52, %v590_v52 }
  0xdc   :  { %vm728_vm5 = vmand %vm680_vm3, %vm672_vm11  ;;  %v491_v40 = vpop.permute.xlu1 %490  ;;  %v487_v32 = vpop.permute.xlu0 %486  ;;  %v1040_v39 = vsel %vm882_vm2, %v1026_v20, 0  ;;  %v385_v20 = vsub.f32 %v1543_v25, %v1612_v19  ;;  %vm695_vm8 = vcmp.lt.f32.partialorder %v646_v6, 4.0 }
  0xdd   :  { %vm745_vm6 = vmand %vm697_vm4, %vm673_vm9  ;;  %v576_v50 = vsub.f32 %v491_v40, %v1664_v38  ;;  %v575_v42 = vsub.f32 %v487_v32, %v1664_v38  ;;  %1046 = vmatpush.bf16.xpose.msra.mxu3 %v1040_v39  ;;  %v1132_v51 = vsel %vm728_vm5, 1.0, %v1246_v12  ;;  %v394_v40 = vsub.f32 %v1625_v63, %v1596_v55 }
  0xde   :  { %v824_v23 = vpack.c.bf16 %v1132_v51, %v1132_v51  ;;  %v1149_v37 = vsel %vm745_vm6, 1.0, %v1246_v12  ;;  %v479_v59 = vpop.permute.xlu2 %478  ;;  %v877_v32 = vunpack.c.l.b16 %v825_v11  ;;  %vm743_vm15 = vmand %vm695_vm8, %vm671_vm7 }
  0xdf   :  { %v608_v14 = vmul.f32 %v576_v50, %v576_v50  ;;  %v607_v54 = vmul.f32 %v575_v42, %v575_v42  ;;  %v841_v57 = vpack.c.bf16 %v1149_v37, %v1149_v37  ;;  %v426_v42 = vmul.f32 %v394_v40, %v394_v40 }
  0xe0   :  { %v876_v2 = vunpack.c.l.b16 %v824_v23  ;;  %v1147_v40 = vsel %vm743_vm15, 1.0, %v1246_v12 }
  0xe1   :  { %v640_v39 = vadd.f32 %v608_v14, %v412_v1  ;;  %v639_v3 = vadd.f32 %v607_v54, %v411_v47  ;;  %v974_v44 = vunpack.c.l.b16 %v841_v57  ;;  %v417_v1 = vmul.f32 %v385_v20, %v385_v20 }
  0xe2   :  { %v881_v33 = vpack.c.b16 %v877_v32, %v876_v2  ;;  %v369_v14 = vsub.f32 %v1479_v46, %v1514_v27  ;;  %v393_v2 = vsub.f32 %v1609_v9, %v1596_v55 }
  0xe3   :  { %vm689_vm10 = vcmp.lt.f32.partialorder %v640_v39, 4.0  ;;  %vm688_vm12 = vcmp.lt.f32.partialorder %v639_v3, 4.0  ;;  %v978_v50 = vpack.c.b16 %v974_v44, %v973_v8  ;;  %v654_v8 = vadd.f32 %v622_v60, %v426_v42 }
  0xe4   :  { %vm737_vm13 = vmand %vm689_vm10, %vm673_vm9  ;;  %v511_v25 = vpop.permute.xlu1 %510  ;;  %v447_v63 = vpop.permute.xlu0 %446  ;;  %v896_v47 = vsel %vm882_vm2, %v881_v33, 0  ;;  %vm670_vm9 = vcmp.lt.s32.totalorder %v1622_v49, %v1702_v26  ;;  %v573_v44 = vsub.f32 %v479_v59, %v1664_v38  ;;  %v839_v33 = vpack.c.bf16 %v1147_v40, %v1147_v40 }
  0xe5   :  { %vm736_vm14 = vmand %vm688_vm12, %vm672_vm11  ;;  %v581_v11 = vsub.f32 %v511_v25, %v1607_v7  ;;  %902 = vmatpush.bf16.xpose.msra.mxu0 %v896_v47  ;;  %v992_v3 = vsel %vm882_vm2, %v978_v50, 0  ;;  %v1141_v36 = vsel %vm737_vm13, 1.0, %v1246_v12  ;;  %v565_v52 = vsub.f32 %v447_v63, %v1603_v41 }
  0xe6   :  { %998 = vmatpush.bf16.xpose.msra.mxu2 %v992_v3  ;;  %v1140_v51 = vsel %vm736_vm14, 1.0, %v1246_v12  ;;  %v833_v6 = vpack.c.bf16 %v1141_v36, %v1141_v36  ;;  %vm703_vm11 = vcmp.lt.f32.partialorder %v654_v8, 4.0  ;;  %v401_v50 = vmul.f32 %v369_v14, %v369_v14 }
  0xe7   :  { %v613_v53 = vmul.f32 %v581_v11, %v581_v11  ;;  %v339_v23 = vpop.permute.xlu2 %338  ;;  %v832_v37 = vpack.c.bf16 %v1140_v51, %v1140_v51  ;;  %v597_v32 = vmul.f32 %v565_v52, %v565_v52  ;;  %v370_v63 = vsub.f32 %v1491_v43, %v1514_v27  ;;  %vm751_vm3 = vmand %vm703_vm11, %vm671_vm7 }
  0xe8   :  { %v926_v20 = vunpack.c.l.b16 %v833_v6  ;;  %v377_v59 = vsub.f32 %v1558_v10, %v1497_v5  ;;  %v391_v47 = vsub.f32 %v1563_v35, %v1596_v55  ;;  %v425_v11 = vmul.f32 %v393_v2, %v393_v2 }
  0xe9   :  { %v645_v54 = vadd.f32 %v613_v53, %v417_v1  ;;  %v925_v57 = vunpack.c.l.b16 %v832_v37  ;;  %v629_v3 = vadd.f32 %v597_v32, %v401_v50  ;;  %v605_v36 = vmul.f32 %v573_v44, %v573_v44 }
  0xea   :  { %v392_v53 = vsub.f32 %v339_v23, %v1596_v55  ;;  %v972_v37 = vunpack.c.l.b16 %v839_v33  ;;  %v1155_v35 = vsel %vm751_vm3, 1.0, %v1246_v12  ;;  %v402_v14 = vmul.f32 %v370_v63, %v370_v63 }
  0xeb   :  { %vm694_vm0 = vcmp.lt.f32.partialorder %v645_v54, 4.0  ;;  %v930_v39 = vpack.c.b16 %v926_v20, %v925_v57  ;;  %v409_v54 = vmul.f32 %v377_v59, %v377_v59  ;;  %v423_v8 = vmul.f32 %v391_v47, %v391_v47 }
  0xec   :  { %vm742_vm1 = vmand %vm694_vm0, %vm670_vm9  ;;  %v543_v46 = vpop.permute.xlu1 %542  ;;  %v503_v60 = vpop.permute.xlu0 %502  ;;  %vm678_vm4 = vcmp.lt.f32.partialorder %v629_v3, 4.0  ;;  %v1735_v20 = vadd.s32 16, %v1446_v4  ;;  %v424_v23 = vmul.f32 %v392_v53, %v392_v53  ;;  %v1756_v47 = vadd.s32 24, %v1446_v4 }
  0xed   :  { %v589_v42 = vsub.f32 %v543_v46, %v1592_v29  ;;  %v944_v9 = vsel %vm882_vm2, %v930_v39, 0  ;;  %v1146_v25 = vsel %vm742_vm1, 1.0, %v1246_v12  ;;  %v637_v2 = vadd.f32 %v605_v36, %v409_v54  ;;  %vm1750_vm8 = vmand %vm678_vm4, %vm670_vm9 }
  0xee   :  { %950 = vmatpush.bf16.xpose.msra.mxu1 %v944_v9  ;;  %v838_v1 = vpack.c.bf16 %v1146_v25, %v1146_v25  ;;  %v847_v46 = vpack.c.bf16 %v1155_v35, %v1155_v35  ;;  %v368_v25 = vsub.f32 %v1528_v24, %v1514_v27  ;;  %v579_v59 = vsub.f32 %v503_v60, %v1607_v7 }
  0xef   :  { %v621_v51 = vmul.f32 %v589_v42, %v589_v42  ;;  %vm668_vm10 = vcmp.lt.s32.totalorder %v1622_v49, %v1735_v20  ;;  %vm686_vm13 = vcmp.lt.f32.partialorder %v637_v2, 4.0  ;;  %v382_v53 = vsub.f32 %v1536_v31, %v1612_v19 }
  0xf0   :  { %v535_v43 = vpop.permute.xlu2 %534  ;;  %v971_v52 = vunpack.c.l.b16 %v838_v1  ;;  %v1020_v36 = vunpack.c.l.b16 %v847_v46  ;;  %vm669_vm15 = vcmp.lt.s32.totalorder %v1622_v49, %v1756_v47  ;;  %v378_v35 = vsub.f32 %v1556_v28, %v1497_v5  ;;  %vm1778_vm11 = vmand %vm686_vm13, %vm670_vm9 }
  0xf1   :  { %v653_v10 = vadd.f32 %v621_v51, %v425_v11  ;;  %v587_v6 = vsub.f32 %v535_v43, %v1592_v29  ;;  %v383_v51 = vsub.f32 %v1573_v18, %v1612_v19  ;;  %v414_v2 = vmul.f32 %v382_v53, %v382_v53 }
  0xf2   :  { %v977_v57 = vpack.c.b16 %v972_v37, %v971_v52  ;;  %v1130_v37 = vsel %vm1750_vm8, 1.0, %v1246_v12  ;;  %v375_v63 = vsub.f32 %v1545_v34, %v1497_v5  ;;  %vm666_vm8 = vcmp.lt.s32.totalorder %v1622_v49, %v1446_v4 }
  0xf3   :  { %vm702_vm5 = vcmp.lt.f32.partialorder %v653_v10, 4.0  ;;  %v619_v40 = vmul.f32 %v587_v6, %v587_v6  ;;  %v611_v10 = vmul.f32 %v579_v59, %v579_v59  ;;  %v415_v54 = vmul.f32 %v383_v51, %v383_v51 }
  0xf4   :  { %vm750_vm6 = vmand %vm702_vm5, %vm670_vm9  ;;  %v451_v32 = vpop.permute.xlu1 %450  ;;  %v539_v39 = vpop.permute.xlu0 %538  ;;  %v989_v44 = vsel %vm882_vm2, %v977_v57, 0  ;;  %v822_v28 = vpack.c.bf16 %v1130_v37, %v1130_v37 }
  0xf5   :  { %v651_v33 = vadd.f32 %v619_v40, %v423_v8  ;;  %v566_v50 = vsub.f32 %v451_v32, %v1603_v41  ;;  %v588_v42 = vsub.f32 %v539_v39, %v1592_v29  ;;  %999 = vmatpush.bf16.xpose.msra.mxu2 %v989_v44  ;;  %v1154_v9 = vsel %vm750_vm6, 1.0, %v1246_v12 }
  0xf6   :  { %v846_v1 = vpack.c.bf16 %v1154_v9, %v1154_v9  ;;  %v643_v39 = vadd.f32 %v611_v10, %v415_v54  ;;  %v390_v10 = vsub.f32 %v1584_v45, %v1596_v55 }
  0xf7   :  { %vm700_vm12 = vcmp.lt.f32.partialorder %v651_v33, 4.0  ;;  %v598_v11 = vmul.f32 %v566_v50, %v566_v50  ;;  %v620_v24 = vmul.f32 %v588_v42, %v588_v42  ;;  %v410_v50 = vmul.f32 %v378_v35, %v378_v35 }
  0xf8   :  { %vm748_vm14 = vmand %vm700_vm12, %vm668_vm10  ;;  %v443_v3 = vpop.permute.xlu2 %442  ;;  %v1019_v60 = vunpack.c.l.b16 %v846_v1  ;;  %v381_v42 = vsub.f32 %v1565_v15, %v1612_v19  ;;  %v874_v1 = vunpack.c.l.b16 %v822_v28  ;;  %v384_v15 = vsub.f32 %v1571_v17, %v1612_v19 }
  0xf9   :  { %v630_v43 = vadd.f32 %v598_v11, %v402_v14  ;;  %v652_v52 = vadd.f32 %v620_v24, %v424_v23  ;;  %v1152_v6 = vsel %vm748_vm14, 1.0, %v1246_v12  ;;  %v400_v14 = vmul.f32 %v368_v25, %v368_v25 }
  0xfa   :  { %v1025_v18 = vpack.c.b16 %v1020_v36, %v1019_v60  ;;  %v844_v32 = vpack.c.bf16 %v1152_v6, %v1152_v6  ;;  %v564_v44 = vsub.f32 %v443_v3, %v1603_v41  ;;  %v1138_v24 = vsel %vm1778_vm11, 1.0, %v1246_v12 }
  0xfb   :  { %vm679_vm0 = vcmp.lt.f32.partialorder %v630_v43, 4.0  ;;  %vm701_vm1 = vcmp.lt.f32.partialorder %v652_v52, 4.0  ;;  %vm692_vm4 = vcmp.lt.f32.partialorder %v643_v39, 4.0  ;;  %v413_v52 = vmul.f32 %v381_v42, %v381_v42 }
  0xfc   :  { %vm727_vm3 = vmand %vm679_vm0, %vm671_vm7  ;;  %v483_v8 = vpop.permute.xlu1 %482  ;;  %v471_v57 = vpop.permute.xlu0 %470  ;;  %v1037_v40 = vsel %vm882_vm2, %v1025_v18, 0  ;;  %v1017_v60 = vunpack.c.l.b16 %v844_v32  ;;  %v596_v53 = vmul.f32 %v564_v44, %v564_v44  ;;  %v830_v35 = vpack.c.bf16 %v1138_v24, %v1138_v24 }
  0xfd   :  { %vm749_vm9 = vmand %vm701_vm1, %vm669_vm15  ;;  %v574_v26 = vsub.f32 %v483_v8, %v1664_v38  ;;  %1047 = vmatpush.bf16.xpose.msra.mxu3 %v1037_v40  ;;  %v1131_v23 = vsel %vm727_vm3, 1.0, %v1246_v12  ;;  %v571_v18 = vsub.f32 %v471_v57, %v1664_v38  ;;  %v416_v40 = vmul.f32 %v384_v15, %v384_v15 }
  0xfe   :  { %v823_v46 = vpack.c.bf16 %v1131_v23, %v1131_v23  ;;  %v1153_v33 = vsel %vm749_vm9, 1.0, %v1246_v12  ;;  %vm1817_vm12 = vmand %vm692_vm4, %vm668_vm10  ;;  %v628_v28 = vadd.f32 %v596_v53, %v400_v14 }
  0xff   :  { %v606_v9 = vmul.f32 %v574_v26, %v574_v26  ;;  %v845_v25 = vpack.c.bf16 %v1153_v33, %v1153_v33  ;;  %v1825_v26 = vadd.s32 8, %v1446_v4  ;;  %v1144_v14 = vsel %vm1817_vm12, 1.0, %v1246_v12 }
 0x100   :  { %v495_v59 = vpop.permute.xlu2 %494  ;;  %v875_v11 = vunpack.c.l.b16 %v823_v46  ;;  %v923_v46 = vunpack.c.l.b16 %v830_v35  ;;  %v603_v33 = vmul.f32 %v571_v18, %v571_v18  ;;  %vm677_vm14 = vcmp.lt.f32.partialorder %v628_v28, 4.0 }
 0x101   :  { %v638_v51 = vadd.f32 %v606_v9, %v410_v50  ;;  %v577_v3 = vsub.f32 %v495_v59, %v1607_v7  ;;  %v1018_v36 = vunpack.c.l.b16 %v845_v25  ;;  %v367_v25 = vsub.f32 %v1519_v13, %v1514_v27  ;;  %vm1852_vm4 = vmand %vm677_vm14, %vm669_vm15 }
 0x102   :  { %v880_v43 = vpack.c.b16 %v875_v11, %v874_v1  ;;  %v407_v59 = vmul.f32 %v375_v63, %v375_v63  ;;  %vm667_vm11 = vcmp.lt.s32.totalorder %v1622_v49, %v1825_v26  ;;  %v422_v28 = vmul.f32 %v390_v10, %v390_v10  ;;  %v65_v49 = vld [vmem:[%s1999_s2] sm:$0x1] }
 0x103   :  { %vm687_vm5 = vcmp.lt.f32.partialorder %v638_v51, 4.0  ;;  %v609_v34 = vmul.f32 %v577_v3, %v577_v3  ;;  %v1024_v37 = vpack.c.b16 %v1018_v36, %v1017_v60  ;;  %v836_v51 = vpack.c.bf16 %v1144_v14, %v1144_v14 }
 0x104   :  { %vm1806_vm6 = vmand %vm687_vm5, %vm671_vm7  ;;  %v507_v17 = vpop.permute.xlu1 %506  ;;  %v499_v19 = vpop.permute.xlu0 %498  ;;  %v893_v6 = vsel %vm882_vm2, %v880_v43, 0  ;;  %v635_v3 = vadd.f32 %v603_v33, %v407_v59  ;;  %v399_v43 = vmul.f32 %v367_v25, %v367_v25  ;;  %v1890_v25 = vld [vmem:[%s1999_s2 + $0x2] sm:$0x1] }
 0x105   :  { %v641_v22 = vadd.f32 %v609_v34, %v413_v52  ;;  %v580_v54 = vsub.f32 %v507_v17, %v1607_v7  ;;  %v578_v8 = vsub.f32 %v499_v19, %v1607_v7  ;;  %903 = vmatpush.bf16.xpose.msra.mxu0 %v893_v6  ;;  %v1034_v57 = vsel %vm882_vm2, %v1024_v37, 0 }
 0x106   :  { %1048 = vmatpush.bf16.xpose.msra.mxu3 %v1034_v57  ;;  %v1139_v23 = vsel %vm1806_vm6, 1.0, %v1246_v12  ;;  %v376_v37 = vsub.f32 %v1517_v16, %v1497_v5  ;;  %v969_v17 = vunpack.c.l.b16 %v836_v51  ;;  %vm684_vm5 = vcmp.lt.f32.partialorder %v635_v3, 4.0 }
 0x107   :  { %vm690_vm7 = vcmp.lt.f32.partialorder %v641_v22, 4.0  ;;  %v612_v32 = vmul.f32 %v580_v54, %v580_v54  ;;  %v610_v39 = vmul.f32 %v578_v8, %v578_v8  ;;  %v831_v44 = vpack.c.bf16 %v1139_v23, %v1139_v23 }
 0x108   :  { %vm738_vm13 = vmand %vm690_vm7, %vm666_vm8  ;;  %v531_v7 = vpop.permute.xlu2 %530  ;;  %v1129_v22 = vsel %vm1852_vm4, 1.0, %v1246_v12  ;;  %v405_v5 = vmul.f32 %v1504_v61, %v1504_v61  ;;  %vm71_vm14 = vcmp.gt.s32.totalorder %v1890_v25, 0  ;;  %v389_v3 = vsub.f32 %v1589_v58, %v1596_v55 }
 0x109   :  { %v644_v50 = vadd.f32 %v612_v32, %v416_v40  ;;  %v642_v42 = vadd.f32 %v610_v39, %v414_v2  ;;  %v924_v9 = vunpack.c.l.b16 %v831_v44  ;;  %v1142_v11 = vsel %vm738_vm13, 1.0, %v1246_v12  ;;  %vm1876_vm7 = vmand %vm684_vm5, %vm668_vm10 }
 0x10a   :  { %v586_v60 = vsub.f32 %v531_v7, %v1592_v29  ;;  %v834_v53 = vpack.c.bf16 %v1142_v11, %v1142_v11  ;;  %v408_v40 = vmul.f32 %v376_v37, %v376_v37  ;;  %v821_v39 = vpack.c.bf16 %v1129_v22, %v1129_v22 }
 0x10b   :  { %vm693_vm0 = vcmp.lt.f32.partialorder %v644_v50, 4.0  ;;  %vm691_vm1 = vcmp.lt.f32.partialorder %v642_v42, 4.0  ;;  %v929_v1 = vpack.c.b16 %v924_v9, %v923_v46  ;;  %v406_v50 = vmul.f32 %v1548_v62, %v1548_v62 }
 0x10c   :  { %vm741_vm3 = vmand %vm693_vm0, %vm669_vm15  ;;  %v439_v24 = vpop.permute.xlu1 %438  ;;  %v431_v2 = vpop.permute.xlu0 %430  ;;  %v618_v54 = vmul.f32 %v586_v60, %v586_v60  ;;  %v967_v8 = vunpack.c.l.b16 %v834_v53  ;;  %v873_v62 = vunpack.c.l.b16 %v821_v39  ;;  %v1136_v11 = vsel %vm1876_vm7, 1.0, %v1246_v12 }
 0x10d   :  { %vm739_vm9 = vmand %vm691_vm1, %vm667_vm11  ;;  %v563_v27 = vsub.f32 %v439_v24, %v1603_v41  ;;  %v941_v13 = vsel %vm882_vm2, %v929_v1, 0  ;;  %v1145_v36 = vsel %vm741_vm3, 1.0, %v1246_v12  ;;  %v561_v9 = vsub.f32 %v431_v2, %v1603_v41 }
 0x10e   :  { %951 = vmatpush.bf16.xpose.msra.mxu1 %v941_v13  ;;  %v1143_v15 = vsel %vm739_vm9, 1.0, %v1246_v12  ;;  %v837_v34 = vpack.c.bf16 %v1145_v36, %v1145_v36  ;;  %v650_v42 = vadd.f32 %v618_v54, %v422_v28  ;;  %v397_v60 = vmul.f32 %v1522_v21, %v1522_v21 }
 0x10f   :  { %v595_v52 = vmul.f32 %v563_v27, %v563_v27  ;;  %v835_v19 = vpack.c.bf16 %v1143_v15, %v1143_v15  ;;  %v593_v13 = vmul.f32 %v561_v9, %v561_v9  ;;  %v828_v53 = vpack.c.bf16 %v1136_v11, %v1136_v11 }
 0x110   :  { %v463_v18 = vpop.permute.xlu2 %462  ;;  %v970_v31 = vunpack.c.l.b16 %v837_v34  ;;  %vm699_vm0 = vcmp.lt.f32.partialorder %v650_v42, 4.0  ;;  %v1160_v58 = vsel %vm71_vm14, 1.0, %v1246_v12  ;;  %v421_v37 = vmul.f32 %v389_v3, %v389_v3 }
 0x111   :  { %v627_v6 = vadd.f32 %v595_v52, %v399_v43  ;;  %v569_v35 = vsub.f32 %v463_v18, %v1664_v38  ;;  %v968_v57 = vunpack.c.l.b16 %v835_v19  ;;  %v625_v10 = vadd.f32 %v593_v13, %v397_v60 }
 0x112   :  { %v976_v45 = vpack.c.b16 %v970_v31, %v969_v17 }
 0x113   :  { %vm676_vm6 = vcmp.lt.f32.partialorder %v627_v6, 4.0  ;;  %v601_v16 = vmul.f32 %v569_v35, %v569_v35  ;;  %v975_v44 = vpack.c.b16 %v968_v57, %v967_v8  ;;  %v860_v6 = vpack.c.bf16 %v1160_v58, %v1160_v58 }
 0x114   :  { %vm724_vm12 = vmand %vm676_vm6, %vm668_vm10  ;;  %v475_v23 = vpop.permute.xlu1 %474  ;;  %v467_v32 = vpop.permute.xlu0 %466  ;;  %v986_v33 = vsel %vm882_vm2, %v976_v45, 0  ;;  %vm674_vm5 = vcmp.lt.f32.partialorder %v625_v10, 4.0 }
 0x115   :  { %v633_v61 = vadd.f32 %v601_v16, %v405_v5  ;;  %v572_v46 = vsub.f32 %v475_v23, %v1664_v38  ;;  %v570_v14 = vsub.f32 %v467_v32, %v1664_v38  ;;  %1000 = vmatpush.bf16.xpose.msra.mxu2 %v986_v33  ;;  %v1128_v20 = vsel %vm724_vm12, 1.0, %v1246_v12  ;;  %vm722_vm7 = vmand %vm674_vm5, %vm666_vm8 }
 0x116   :  { %v820_v38 = vpack.c.bf16 %v1128_v20, %v1128_v20  ;;  %v983_v15 = vsel %vm882_vm2, %v975_v44, 0  ;;  %v398_v32 = vmul.f32 %v1531_v30, %v1531_v30  ;;  %v66_v44 = vld [vmem:[%s1999_s2 + $0x1] sm:$0x1]  ;;  %v1126_v4 = vsel %vm722_vm7, 1.0, %v1246_v12 }
 0x117   :  { %vm682_vm10 = vcmp.lt.f32.partialorder %v633_v61, 4.0  ;;  %v604_v59 = vmul.f32 %v572_v46, %v572_v46  ;;  %v602_v1 = vmul.f32 %v570_v14, %v570_v14 }
 0x118   :  { %vm730_vm13 = vmand %vm682_vm10, %vm666_vm8  ;;  %v872_v51 = vunpack.c.l.b16 %v820_v38 }
 0x119   :  { %v636_v24 = vadd.f32 %v604_v59, %v408_v40  ;;  %v634_v2 = vadd.f32 %v602_v1, %v406_v50  ;;  %v1134_v27 = vsel %vm730_vm13, 1.0, %v1246_v12  ;;  %v818_v50 = vpack.c.bf16 %v1126_v4, %v1126_v4 }
 0x11a   :  { %v879_v63 = vpack.c.b16 %v873_v62, %v872_v51  ;;  %v826_v47 = vpack.c.bf16 %v1134_v27, %v1134_v27  ;;  %v2018_v27 = vmov 0  }
 0x11b   :  { %vm685_vm1 = vcmp.lt.f32.partialorder %v636_v24, 4.0  ;;  %vm683_vm3 = vcmp.lt.f32.partialorder %v634_v2, 4.0  ;;  %v870_v38 = vunpack.c.l.b16 %v818_v50 }
 0x11c   :  { %vm733_vm9 = vmand %vm685_vm1, %vm669_vm15  ;;  %v527_v36 = vpop.permute.xlu1 %526  ;;  %v890_v21 = vsel %vm882_vm2, %v879_v63, 0  ;;  %v919_v31 = vunpack.c.l.b16 %v826_v47 }
 0x11d   :  { %vm731_vm4 = vmand %vm683_vm3, %vm667_vm11  ;;  %v585_v55 = vsub.f32 %v527_v36, %v1592_v29  ;;  %v1137_v43 = vsel %vm733_vm9, 1.0, %v1246_v12  ;;  %904 = vmatpush.bf16.xpose.msra.mxu0 %v890_v21  ;;  %1001 = vmatpush.bf16.xpose.msra.mxu2 %v983_v15  ;;  %v921_v29 = vunpack.c.l.b16 %v828_v53  ;;  %vm1087_vm3 = vcmask 516096  }
 0x11e   :  { %vm747_vm15 = vmand %vm699_vm0, %vm667_vm11  ;;  %v829_v52 = vpack.c.bf16 %v1137_v43, %v1137_v43  ;;  %v1135_v34 = vsel %vm731_vm4, 1.0, %v1246_v12  ;;  %vm1248_vm9 = vmmov 1  }
 0x11f   :  { %v617_v18 = vmul.f32 %v585_v55, %v585_v55  ;;  %v827_v17 = vpack.c.bf16 %v1135_v34, %v1135_v34  ;;  %v1151_v54 = vsel %vm747_vm15, 1.0, %v1246_v12 }
 0x120   :  { %v922_v19 = vunpack.c.l.b16 %v829_v52  ;;  %v843_v45 = vpack.c.bf16 %v1151_v54, %v1151_v54 }
 0x121   :  { %v649_v35 = vadd.f32 %v617_v18, %v421_v37  ;;  %v920_v22 = vunpack.c.l.b16 %v827_v17  ;;  %v2019_v37 = vld [vmem:[#allocation8_spill] sm:$0xff] }
 0x122   :  { %v928_v8 = vpack.c.b16 %v922_v19, %v921_v29  ;;  %v1016_v61 = vunpack.c.l.b16 %v843_v45 }
 0x123   :  { %vm698_vm6 = vcmp.lt.f32.partialorder %v649_v35, 4.0  ;;  %v927_v57 = vpack.c.b16 %v920_v22, %v919_v31 }
 0x124   :  { %vm746_vm12 = vmand %vm698_vm6, %vm666_vm8  ;;  %v435_v5 = vpop.permute.xlu1 %434  ;;  %v938_v16 = vsel %vm882_vm2, %v928_v8, 0  ;;  %1164 = vmatmul.msk.bf16.vlgmr.msra.gmra.mxu2 %vm882_vm2, %v860_v6  ;;  %vm70_vm8 = vcmp.gt.s32.totalorder %v66_v44, 0 }
 0x125   :  { %v562_v40 = vsub.f32 %v435_v5, %v1603_v41  ;;  %952 = vmatpush.bf16.xpose.msra.mxu1 %v938_v16  ;;  %v1150_v28 = vsel %vm746_vm12, 1.0, %v1246_v12  ;;  %v1941_v41 = vld [vmem:[%s1999_s2 + $0x3] sm:$0x1]  ;;  %v935_v30 = vsel %vm882_vm2, %v927_v57, 0  ;;  %v1159_v42 = vsel %vm70_vm8, 1.0, %v1246_v12  ;;  %s1249_s2 = smov [#allocation4]  }
 0x126   :  { %v842_v23 = vpack.c.bf16 %v1150_v28, %v1150_v28  ;;  %vm72_vm10 = vcmp.gt.s32.totalorder %v1941_v41, 0  ;;  %v859_v26 = vpack.c.bf16 %v1159_v42, %v1159_v42  ;;  %s1110_s11 = sshll.u32 %s1249_s2, 4  ;;  %s1111_s11 = int_to_ptr.vmem [resolvable:$true] %s1110_s11 }
 0x127   :  { %v594_v39 = vmul.f32 %v562_v40, %v562_v40  ;;  %v1161_v9 = vsel %vm72_vm10, 1.0, %v1246_v12 }
 0x128   :  { %v1015_v7 = vunpack.c.l.b16 %v842_v23  ;;  %v861_v1 = vpack.c.bf16 %v1161_v9, %v1161_v9 }
 0x129   :  { %v626_v46 = vadd.f32 %v594_v39, %v398_v32 }
 0x12a   :  { %v1023_v14 = vpack.c.b16 %v1016_v61, %v1015_v7 }
 0x12b   :  { %vm675_vm13 = vcmp.lt.f32.partialorder %v626_v46, 4.0 }
 0x12c   :  { %vm723_vm0 = vmand %vm675_vm13, %vm667_vm11  ;;  %v1031_v33 = vsel %vm882_vm2, %v1023_v14, 0  ;;  %vm69_vm11 = vcmp.gt.s32.totalorder %v65_v49, 0 }
 0x12d   :  { %953 = vmatpush.bf16.xpose.msra.mxu1 %v935_v30  ;;  %1049 = vmatpush.bf16.xpose.msra.mxu3 %v1031_v33  ;;  %v1127_v20 = vsel %vm723_vm0, 1.0, %v1246_v12  ;;  %v1158_v2 = vsel %vm69_vm11, 1.0, %v1246_v12 }
 0x12e   :  { %v819_v59 = vpack.c.bf16 %v1127_v20, %v1127_v20  ;;  %v858_v51 = vpack.c.bf16 %v1158_v2, %v1158_v2 }
 0x130   :  { %v871_v62 = vunpack.c.l.b16 %v819_v59 }
 0x132   :  { %v878_v11 = vpack.c.b16 %v871_v62, %v870_v38 }
 0x134   :  { %1163 = vmatmul.msk.bf16.vlgmr.msra.gmra.mxu1 %vm882_vm2, %v859_v26  ;;  %1165 = vmatmul.msk.bf16.vlgmr.msra.gmra.mxu3 %vm882_vm2, %v861_v1  ;;  %v887_v24 = vsel %vm882_vm2, %v878_v11, 0 }
 0x135   :  { %905 = vmatpush.bf16.xpose.msra.mxu0 %v887_v24 }
 0x13c   :  { %1162 = vmatmul.msk.bf16.vlgmr.msra.gmra.mxu0 %vm882_vm2, %v858_v51 }
 0x1a7   :  { %v1003_v3 = vpop.f32.mrf.mxu2 }
 0x1a8   :  { %vm1057_vm1 = vcmp.gt.f32.partialorder %v1003_v3, 0.0 }
 0x1a9   :  { %vm1061_vm4 = vmxor %vm1057_vm1, %vm1248_vm9 }
 0x1aa   :  { %vm1065_vm15 = vmand %vm71_vm14, %vm1061_vm4 }
 0x1ab   :  { %v1069_v13 = vsel %vm1065_vm15, 1, %v2018_v27 }
 0x1ac   :  { %v1073_v63 = vperm.slane %v1069_v13, 0  ;;  %1090 = vst.msk [vmem:[#allocation4 + $0x2] sm:$0x1] %vm1087_vm3, %v1069_v13 }
 0x1ae   :  { %vm1077_vm5 = vcmp.eq.s32.totalorder %v1073_v63, 1 }
 0x1af   :  { %v1081_v12 = vsel %vm1077_vm5, %v1600_v56, 0.0  ;;  %v1005_v60 = vpop.f32.mrf.mxu2 }
 0x1b0   :  { %1085 = vst.msk [vmem:[#allocation2 + $0x10] sm:$0xff] %vm882_vm2, %v1081_v12 }
 0x1b1   :  { %v955_v36 = vpop.f32.mrf.mxu1 }
 0x1b2   :  { %vm1056_vm6 = vcmp.gt.f32.partialorder %v955_v36, 0.0 }
 0x1b3   :  { %vm1060_vm12 = vmxor %vm1056_vm6, %vm1248_vm9 }
 0x1b4   :  { %vm1064_vm7 = vmand %vm70_vm8, %vm1060_vm12 }
 0x1b5   :  { %v1068_v25 = vsel %vm1064_vm7, 1, %v2018_v27 }
 0x1b6   :  { %v1072_v15 = vperm.slane %v1068_v25, 0  ;;  %1089 = vst.msk [vmem:[#allocation4 + $0x1] sm:$0x1] %vm1087_vm3, %v1068_v25 }
 0x1b7   :  { %v1051_v53 = vpop.f32.mrf.mxu3 }
 0x1b8   :  { %vm1076_vm14 = vcmp.eq.s32.totalorder %v1072_v15, 1  ;;  %vm1058_vm13 = vcmp.gt.f32.partialorder %v1051_v53, 0.0 }
 0x1b9   :  { %v1080_v58 = vsel %vm1076_vm14, %v1494_v0, 0.0  ;;  %vm1062_vm0 = vmxor %vm1058_vm13, %vm1248_vm9  ;;  %v907_v56 = vpop.f32.mrf.mxu0  ;;  %v957_v55 = vpop.f32.mrf.mxu1 }
 0x1ba   :  { %1084 = vst.msk [vmem:[#allocation2 + $0x8] sm:$0xff] %vm882_vm2, %v1080_v58  ;;  %vm1066_vm8 = vmand %vm72_vm10, %vm1062_vm0  ;;  %vm1055_vm1 = vcmp.gt.f32.partialorder %v907_v56, 0.0 }
 0x1bb   :  { %v1070_v21 = vsel %vm1066_vm8, 1, %v2018_v27  ;;  %vm1059_vm4 = vmxor %vm1055_vm1, %vm1248_vm9 }
 0x1bc   :  { %v1074_v0 = vperm.slane %v1070_v21, 0  ;;  %1091 = vst.msk [vmem:[#allocation4 + $0x3] sm:$0x1] %vm1087_vm3, %v1070_v21  ;;  %vm1063_vm15 = vmand %vm69_vm11, %vm1059_vm4 }
 0x1bd   :  { %v1067_v43 = vsel %vm1063_vm15, 1, %v2018_v27 }
 0x1be   :  { %vm1078_vm10 = vcmp.eq.s32.totalorder %v1074_v0, 1  ;;  %v1071_v47 = vperm.slane %v1067_v43, 0  ;;  %1088 = vst.msk [vmem:[#allocation4] sm:$0x1] %vm1087_vm3, %v1067_v43 }
 0x1bf   :  { %v1082_v52 = vsel %vm1078_vm10, %v1587_v48, 0.0  ;;  %v1053_v34 = vpop.f32.mrf.mxu3  ;;  %1115 = dma.vmem_to_hbm [thread:$0]  %s1111_s11, 64, %s1113_s14, [#allocation5]  }
 0x1c0   :  { %1086 = vst.msk [vmem:[#allocation2 + $0x18] sm:$0xff] %vm882_vm2, %v1082_v52  ;;  %vm1075_vm9 = vcmp.eq.s32.totalorder %v1071_v47, 1 }
 0x1c1   :  { %v1079_v10 = vsel %vm1075_vm9, %v2019_v37, 0.0  ;;  %v909_v18 = vpop.f32.mrf.mxu0 }
 0x1c2   :  { %1083 = vst.msk [vmem:[#allocation2] sm:$0xff] %vm882_vm2, %v1079_v10 }
 0x1c3   :  { %1104 = dma.vmem_to_hbm [thread:$0]  %s1097_s16, 512, %s1099_s19, [#allocation3], %s1251_s3, %s1251_s3, %s1252_s4  }
 0x1c4   :  { %1241 = dma.done.wait [#allocation3], 512  }
 0x1c5   :  { %1242 = vsyncadd [#allocation3], 4294966784 }
 0x1c6   :  { %1243 = dma.done.wait [#allocation5], 64  }
 0x1c7   :  { %1244 = vsyncadd [#allocation5], 4294967232 }
 0x1c8   :  { %1124 = vsyncpa [#allocation3], 1 }
 0x1c9   :  { %1125 = vsyncpa [#allocation5], 1 }

</bundles_post_ra>
